<compile_context>
chip_gen: v7x
topology: tpu7x:2x2x1
jax: 0.10.0
libtpu: 0.0.40
codegen_flags: <defaults>
</compile_context>

<pallas_src>
import functools

import jax
import jax.numpy as jnp
from jax.experimental import pallas as pl
from jax.experimental.pallas import tpu as pltpu


def _round_up(x, m):
    return (x + m - 1) // m * m


def _choose_block(dim, cap):
    """Pick (block, padded_dim): block is a multiple of 128 and <= cap, padded_dim
    is a multiple of block.  Prefers one full-extent block; otherwise the largest
    block whose zero-padding overhead stays small (bigger tiles => higher HBM
    roofline fraction, fewer ~0.35us grid steps; padding is numerically free)."""
    d = _round_up(dim, 128)
    if d <= cap:
        return d, d
    for b in range(cap, 128, -128):
        padded = _round_up(dim, b)
        if padded - dim <= max(b // 2, padded // 8):
            return b, padded
    return 128, d


def _largest_divisor_block(dim, cap):
    """Largest multiple of 128 that divides `dim` (itself a multiple of 128) and
    is <= cap.  Used to pick the K block of the second GEMM (K == padded N)."""
    best = 128
    b = 128
    while b <= min(dim, cap):
        if dim % b == 0:
            best = b
        b += 128
    return best


def _pad2(x, rows, cols):
    pr, pc = rows - x.shape[0], cols - x.shape[1]
    if pr == 0 and pc == 0:
        return x          # skip the extra HBM pass when already aligned
    return jnp.pad(x, ((0, pr), (0, pc)))


# ---------------------------------------------------------------------------
# Tiled matmul kernels (f32 accumulator resident in VMEM across the K grid axis)
# ---------------------------------------------------------------------------
def _matmul_kernel(a_ref, b_ref, o_ref, acc_ref):
    @pl.when(pl.program_id(2) == 0)
    def _():
        acc_ref[...] = jnp.zeros_like(acc_ref)

    acc_ref[...] += jnp.dot(a_ref[...], b_ref[...],
                            preferred_element_type=jnp.float32)

    @pl.when(pl.program_id(2) == pl.num_programs(2) - 1)
    def _():
        o_ref[...] = acc_ref[...].astype(o_ref.dtype)


def _matmul_bias_kernel(a_ref, b_ref, bias_ref, o_ref, acc_ref):
    @pl.when(pl.program_id(2) == 0)
    def _():
        acc_ref[...] = jnp.zeros_like(acc_ref)

    acc_ref[...] += jnp.dot(a_ref[...], b_ref[...],
                            preferred_element_type=jnp.float32)

    @pl.when(pl.program_id(2) == pl.num_programs(2) - 1)
    def _():
        o_ref[...] = (acc_ref[...] + bias_ref[...]).astype(o_ref.dtype)


def _tiled_matmul(a, b, bias=None, *, tm, tn, tk, out_dtype=jnp.float32):
    """C = A @ B (+ bias).  All dims must be divisible by their block sizes."""
    M, K = a.shape
    K2, N = b.shape
    assert K == K2 and M % tm == 0 and N % tn == 0 and K % tk == 0

    in_specs = [
        pl.BlockSpec((tm, tk), lambda i, j, k: (i, k)),
        pl.BlockSpec((tk, tn), lambda i, j, k: (k, j)),
    ]
    args = (a, b)
    kernel = _matmul_kernel
    if bias is not None:
        in_specs.append(pl.BlockSpec((1, tn), lambda i, j, k: (0, j)))
        args = (a, b, bias)
        kernel = _matmul_bias_kernel

    grid_m, grid_n, grid_k = M // tm, N // tn, K // tk

    # --- advisory cost estimate with real dtypes and per-operand re-read factors
    a_is = jnp.dtype(a.dtype).itemsize
    b_is = jnp.dtype(b.dtype).itemsize
    o_is = jnp.dtype(out_dtype).itemsize
    bytes_accessed = M * K * a_is * grid_n + K * N * b_is * grid_m + M * N * o_is
    if bias is not None:
        bytes_accessed += N * jnp.dtype(bias.dtype).itemsize * grid_m
    cost = pl.CostEstimate(flops=2 * M * K * N, transcendentals=0,
                           bytes_accessed=int(bytes_accessed))

    # --- explicit scoped-VMEM budget: 2x double-buffered inputs + 2x output
    #     buffer + f32 accumulator, with headroom, capped below v7x physical.
    vmem_needed = (2 * (tm * tk * a_is + tk * tn * b_is)
                   + 2 * tm * tn * o_is
                   + tm * tn * 4)
    if bias is not None:
        vmem_needed += 2 * tn * 4
    vmem_limit = int(min(max(int(vmem_needed * 1.5) + (4 << 20), 32 << 20),
                         60 << 20))

    return pl.pallas_call(
        kernel,
        out_shape=jax.ShapeDtypeStruct((M, N), out_dtype),
        grid_spec=pltpu.PrefetchScalarGridSpec(
            num_scalar_prefetch=0,
            grid=(grid_m, grid_n, grid_k),
            in_specs=in_specs,
            out_specs=pl.BlockSpec((tm, tn), lambda i, j, k: (i, j)),
            scratch_shapes=[pltpu.VMEM((tm, tn), jnp.float32)],
        ),
        compiler_params=pltpu.CompilerParams(
            dimension_semantics=("parallel", "parallel", "arbitrary"),
            vmem_limit_bytes=vmem_limit),
        cost_estimate=cost,
    )(*args)


# ---------------------------------------------------------------------------
# Module wrapper: GraphConvolution.forward
# ---------------------------------------------------------------------------
@functools.partial(jax.jit, static_argnames=("compute_dtype",))
def graph_convolution(inp, adj, weight, bias=None, *,
                      compute_dtype=jnp.bfloat16):
    """support = inp @ weight; out = adj @ support (+ bias).

    HBM-side operands and the support intermediate live in `compute_dtype`
    (default bf16); all MXU accumulation stays f32; final output is f32.
    """
    N, F_in = inp.shape
    F_out = weight.shape[1]
    cdt = jnp.dtype(compute_dtype)

    mn_cap = 512                               # tm/tn cap (safe f32 on v7x too)
    k_cap = 2048 if cdt.itemsize <= 2 else 1024  # decoupled, larger K block

    t_nodes, n_p = _choose_block(N, mn_cap)      # row block of both GEMMs
    t_fin, k_p = _choose_block(F_in, k_cap)      # K block of GEMM 1
    t_fout, m_p = _choose_block(F_out, mn_cap)   # output-feature block
    t_k2 = _largest_divisor_block(n_p, k_cap)    # K block of GEMM 2 (K == n_p)

    # Narrow dtype first (no-op for f32), then zero-pad to block multiples.
    inp_p = _pad2(inp.astype(cdt), n_p, k_p)
    w_p = _pad2(weight.astype(cdt), k_p, m_p)
    adj_p = _pad2(adj.astype(cdt), n_p, n_p)
    bias_p = None
    if bias is not None:
        bias_p = _pad2(bias.reshape(1, -1).astype(jnp.float32), 1, m_p)

    # support = input @ weight  -- written/read back in compute dtype (halves the
    # HBM round trip of the intermediate; GEMM 2 re-accumulates in f32).
    support = _tiled_matmul(inp_p, w_p, tm=t_nodes, tn=t_fout, tk=t_fin,
                            out_dtype=cdt)
    # output = adj @ support + bias
    out = _tiled_matmul(adj_p, support, bias_p, tm=t_nodes, tn=t_fout, tk=t_k2,
                        out_dtype=jnp.float32)

    return out[:N, :F_out]


def _reference(inp, adj, weight, bias):
    support = inp @ weight
    out = adj @ support
    return out + bias if bias is not None else out


if __name__ == "__main__":
    # Small shapes consistent with the module: N graph nodes, in/out feature dims.
    # Non-multiples of 128 to exercise block selection + padding.
    N, F_IN, F_OUT = 320, 200, 72

    key = jax.random.PRNGKey(0)
    k_in, k_adj, k_w, k_b = jax.random.split(key, 4)

    inp = jax.random.normal(k_in, (N, F_IN), dtype=jnp.float32)
    adj_raw = jax.random.uniform(k_adj, (N, N), dtype=jnp.float32)
    adj = adj_raw / jnp.sum(adj_raw, axis=1, keepdims=True)  # row-normalized adjacency

    # torch.nn init: uniform(-stdv, stdv), stdv = 1/sqrt(out_features)
    stdv = 1.0 / jnp.sqrt(jnp.float32(F_OUT))
    weight = jax.random.uniform(k_w, (F_IN, F_OUT), minval=-stdv, maxval=stdv,
                                dtype=jnp.float32)
    bias = jax.random.uniform(k_b, (F_OUT,), minval=-stdv, maxval=stdv,
                              dtype=jnp.float32)

    ref = _reference(inp, adj, weight, bias)

    # f32 path: bit-for-bit-ish against the reference.
    out_f32 = graph_convolution(inp, adj, weight, bias,
                                compute_dtype=jnp.float32)
    jax.block_until_ready(out_f32)
    assert out_f32.shape == (N, F_OUT)
    assert jnp.allclose(out_f32, ref, atol=1e-4, rtol=1e-4), float(
        jnp.max(jnp.abs(out_f32 - ref)))

    # default bf16 path (production perf config): f32 accumulation, looser tol.
    out_bf16 = graph_convolution(inp, adj, weight, bias)
    jax.block_until_ready(out_bf16)
    assert out_bf16.shape == (N, F_OUT)
    assert jnp.allclose(out_bf16, ref, atol=5e-2, rtol=5e-2), float(
        jnp.max(jnp.abs(out_bf16 - ref)))

    print("KERNEL_OK")
</pallas_src>

<mosaic_0001>
module attributes {stable_mosaic.version = 11 : i64} {
  func.func @_matmul_kernel(%arg0: i32, %arg1: i32, %arg2: i32, %arg3: memref<384x256xf32, #tpu.memory_space<vmem>>, %arg4: memref<256x128xf32, #tpu.memory_space<vmem>>, %arg5: memref<384x128xf32, #tpu.memory_space<vmem>>, %arg6: memref<384x128xf32, #tpu.memory_space<vmem>>) attributes {dimension_semantics = [#tpu.dimension_semantics<parallel>, #tpu.dimension_semantics<parallel>, #tpu.dimension_semantics<arbitrary>], iteration_bounds = array<i64: 1, 1, 1>, scalar_prefetch = 0 : i64, scratch_operands = 1 : i64, tpu.core_type = #tpu.core_type<tc>, window_params = [{transform_indices = @transform_0, window_bounds = array<i64: 384, 256>}, {transform_indices = @transform_1, window_bounds = array<i64: 256, 128>}, {transform_indices = @transform_2, window_bounds = array<i64: 384, 128>}]} {
    %c0_i32 = arith.constant 0 : i32
    %0 = arith.cmpi eq, %arg2, %c0_i32 : i32
    %1 = arith.extui %0 : i1 to i32
    %c0_i32_0 = arith.constant 0 : i32
    %2 = arith.cmpi ne, %1, %c0_i32_0 : i32
    scf.if %2 {
      %cst_10 = arith.constant 0.000000e+00 : f32
      %12 = vector.broadcast %cst_10 : f32 to vector<384x128xf32>
      %c0_11 = arith.constant 0 : index
      %c0_12 = arith.constant 0 : index
      %13 = vector.load %arg6[%c0_11, %c0_12] : memref<384x128xf32, #tpu.memory_space<vmem>>, vector<384x128xf32>
      tpu.vector_store %arg6[%c0_11, %c0_12], %12 {strides = array<i32>} : memref<384x128xf32, #tpu.memory_space<vmem>>, vector<384x128xf32>,
    } else {
    }
    %c0 = arith.constant 0 : index
    %c0_1 = arith.constant 0 : index
    %3 = vector.load %arg6[%c0, %c0_1] : memref<384x128xf32, #tpu.memory_space<vmem>>, vector<384x128xf32>
    %c0_2 = arith.constant 0 : index
    %c0_3 = arith.constant 0 : index
    %4 = vector.load %arg3[%c0_2, %c0_3] : memref<384x256xf32, #tpu.memory_space<vmem>>, vector<384x256xf32>
    %c0_4 = arith.constant 0 : index
    %c0_5 = arith.constant 0 : index
    %5 = vector.load %arg4[%c0_4, %c0_5] : memref<256x128xf32, #tpu.memory_space<vmem>>, vector<256x128xf32>
    %cst = arith.constant dense<0.000000e+00> : vector<384x128xf32>
    %6 = tpu.matmul %4, %5, %cst {dimension_numbers = #tpu.dot_dimension_numbers<[1], [0], [0], [1], [0, 0, 1, 1], [], []>} : vector<384x256xf32>, vector<256x128xf32>, vector<384x128xf32> -> vector<384x128xf32>
    %7 = arith.addf %3, %6 : vector<384x128xf32>
    %c0_6 = arith.constant 0 : index
    %c0_7 = arith.constant 0 : index
    %8 = vector.load %arg6[%c0_6, %c0_7] : memref<384x128xf32, #tpu.memory_space<vmem>>, vector<384x128xf32>
    tpu.vector_store %arg6[%c0_6, %c0_7], %7 {strides = array<i32>} : memref<384x128xf32, #tpu.memory_space<vmem>>, vector<384x128xf32>,
    %c0_i32_8 = arith.constant 0 : i32
    %9 = arith.cmpi eq, %arg2, %c0_i32_8 : i32
    %10 = arith.extui %9 : i1 to i32
    %c0_i32_9 = arith.constant 0 : i32
    %11 = arith.cmpi ne, %10, %c0_i32_9 : i32
    scf.if %11 {
      %c0_10 = arith.constant 0 : index
      %c0_11 = arith.constant 0 : index
      %12 = vector.load %arg6[%c0_10, %c0_11] : memref<384x128xf32, #tpu.memory_space<vmem>>, vector<384x128xf32>
      %c0_12 = arith.constant 0 : index
      %c0_13 = arith.constant 0 : index
      %13 = vector.load %arg5[%c0_12, %c0_13] : memref<384x128xf32, #tpu.memory_space<vmem>>, vector<384x128xf32>
      tpu.vector_store %arg5[%c0_12, %c0_13], %12 {strides = array<i32>} : memref<384x128xf32, #tpu.memory_space<vmem>>, vector<384x128xf32>,
    } else {
    }
    return
  }
  func.func @transform_0(%arg0: i32, %arg1: i32, %arg2: i32) -> (i32, i32) {
    %c0_i32 = arith.constant 0 : i32
    return %arg0, %arg2 : i32, i32
  }
  func.func @transform_1(%arg0: i32, %arg1: i32, %arg2: i32) -> (i32, i32) {
    %c0_i32 = arith.constant 0 : i32
    return %arg2, %arg1 : i32, i32
  }
  func.func @transform_2(%arg0: i32, %arg1: i32, %arg2: i32) -> (i32, i32) {
    %c0_i32 = arith.constant 0 : i32
    return %arg0, %arg1 : i32, i32
  }
}

module attributes {stable_mosaic.version = 11 : i64} {
  func.func @_matmul_bias_kernel(%arg0: i32, %arg1: i32, %arg2: i32, %arg3: memref<384x384xf32, #tpu.memory_space<vmem>>, %arg4: memref<384x128xf32, #tpu.memory_space<vmem>>, %arg5: memref<1x128xf32, #tpu.memory_space<vmem>>, %arg6: memref<384x128xf32, #tpu.memory_space<vmem>>, %arg7: memref<384x128xf32, #tpu.memory_space<vmem>>) attributes {dimension_semantics = [#tpu.dimension_semantics<parallel>, #tpu.dimension_semantics<parallel>, #tpu.dimension_semantics<arbitrary>], iteration_bounds = array<i64: 1, 1, 1>, scalar_prefetch = 0 : i64, scratch_operands = 1 : i64, tpu.core_type = #tpu.core_type<tc>, window_params = [{transform_indices = @transform_0, window_bounds = array<i64: 384, 384>}, {transform_indices = @transform_1, window_bounds = array<i64: 384, 128>}, {transform_indices = @transform_2, window_bounds = array<i64: 1, 128>}, {transform_indices = @transform_3, window_bounds = array<i64: 384, 128>}]} {
    %c0_i32 = arith.constant 0 : i32
    %0 = arith.cmpi eq, %arg2, %c0_i32 : i32
    %1 = arith.extui %0 : i1 to i32
    %c0_i32_0 = arith.constant 0 : i32
    %2 = arith.cmpi ne, %1, %c0_i32_0 : i32
    scf.if %2 {
      %cst_10 = arith.constant 0.000000e+00 : f32
      %12 = vector.broadcast %cst_10 : f32 to vector<384x128xf32>
      %c0_11 = arith.constant 0 : index
      %c0_12 = arith.constant 0 : index
      %13 = vector.load %arg7[%c0_11, %c0_12] : memref<384x128xf32, #tpu.memory_space<vmem>>, vector<384x128xf32>
      tpu.vector_store %arg7[%c0_11, %c0_12], %12 {strides = array<i32>} : memref<384x128xf32, #tpu.memory_space<vmem>>, vector<384x128xf32>,
    } else {
    }
    %c0 = arith.constant 0 : index
    %c0_1 = arith.constant 0 : index
    %3 = vector.load %arg7[%c0, %c0_1] : memref<384x128xf32, #tpu.memory_space<vmem>>, vector<384x128xf32>
    %c0_2 = arith.constant 0 : index
    %c0_3 = arith.constant 0 : index
    %4 = vector.load %arg3[%c0_2, %c0_3] : memref<384x384xf32, #tpu.memory_space<vmem>>, vector<384x384xf32>
    %c0_4 = arith.constant 0 : index
    %c0_5 = arith.constant 0 : index
    %5 = vector.load %arg4[%c0_4, %c0_5] : memref<384x128xf32, #tpu.memory_space<vmem>>, vector<384x128xf32>
    %cst = arith.constant dense<0.000000e+00> : vector<384x128xf32>
    %6 = tpu.matmul %4, %5, %cst {dimension_numbers = #tpu.dot_dimension_numbers<[1], [0], [0], [1], [0, 0, 1, 1], [], []>} : vector<384x384xf32>, vector<384x128xf32>, vector<384x128xf32> -> vector<384x128xf32>
    %7 = arith.addf %3, %6 : vector<384x128xf32>
    %c0_6 = arith.constant 0 : index
    %c0_7 = arith.constant 0 : index
    %8 = vector.load %arg7[%c0_6, %c0_7] : memref<384x128xf32, #tpu.memory_space<vmem>>, vector<384x128xf32>
    tpu.vector_store %arg7[%c0_6, %c0_7], %7 {strides = array<i32>} : memref<384x128xf32, #tpu.memory_space<vmem>>, vector<384x128xf32>,
    %c0_i32_8 = arith.constant 0 : i32
    %9 = arith.cmpi eq, %arg2, %c0_i32_8 : i32
    %10 = arith.extui %9 : i1 to i32
    %c0_i32_9 = arith.constant 0 : i32
    %11 = arith.cmpi ne, %10, %c0_i32_9 : i32
    scf.if %11 {
      %c0_10 = arith.constant 0 : index
      %c0_11 = arith.constant 0 : index
      %12 = vector.load %arg7[%c0_10, %c0_11] : memref<384x128xf32, #tpu.memory_space<vmem>>, vector<384x128xf32>
      %c0_12 = arith.constant 0 : index
      %c0_13 = arith.constant 0 : index
      %13 = vector.load %arg5[%c0_12, %c0_13] : memref<1x128xf32, #tpu.memory_space<vmem>>, vector<1x128xf32>
      %14 = vector.broadcast %13 : vector<1x128xf32> to vector<384x128xf32>
      %15 = arith.addf %12, %14 : vector<384x128xf32>
      %c0_14 = arith.constant 0 : index
      %c0_15 = arith.constant 0 : index
      %16 = vector.load %arg6[%c0_14, %c0_15] : memref<384x128xf32, #tpu.memory_space<vmem>>, vector<384x128xf32>
      tpu.vector_store %arg6[%c0_14, %c0_15], %15 {strides = array<i32>} : memref<384x128xf32, #tpu.memory_space<vmem>>, vector<384x128xf32>,
    } else {
    }
    return
  }
  func.func @transform_0(%arg0: i32, %arg1: i32, %arg2: i32) -> (i32, i32) {
    %c0_i32 = arith.constant 0 : i32
    return %arg0, %arg2 : i32, i32
  }
  func.func @transform_1(%arg0: i32, %arg1: i32, %arg2: i32) -> (i32, i32) {
    %c0_i32 = arith.constant 0 : i32
    return %arg2, %arg1 : i32, i32
  }
  func.func @transform_2(%arg0: i32, %arg1: i32, %arg2: i32) -> (i32, i32) {
    %c0_i32 = arith.constant 0 : i32
    %c0_i32_0 = arith.constant 0 : i32
    return %c0_i32, %arg1 : i32, i32
  }
  func.func @transform_3(%arg0: i32, %arg1: i32, %arg2: i32) -> (i32, i32) {
    %c0_i32 = arith.constant 0 : i32
    return %arg0, %arg1 : i32, i32
  }
}

</mosaic_0001>

<bundles_post_ra>
// kernel: graph_convolution.2
= control target key start
LH: loop header
LB: loop body
LE: loop exit
PB: predicated region body
PF: predicated region fallthrough
CT: control target
= control target key end

     0   :  { %v824_v0 = vmov 0.0|0.0   ;;  %s1400_s1 = inlined_call_operand.vmem [shape: f32[256,128], index: 1, kind: input, shape index: {}]   ;;  %s1401_s0 = inlined_call_operand.vmem [shape: f32[384,256], index: 0, kind: input, shape index: {}]   ;;  %s1402_s2 = inlined_call_operand.vmem [shape: f32[384,128], index: 2, kind: output, shape index: {}]  }
   0x1   :  { %743 = vmatprep.subr.bf16.mxu0 %v824_v0  ;;  %791 = vmatprep.subr.bf16.mxu1 %v824_v0  ;;  %v207_v1 = vld [vmem:[%s1400_s1] sm:$0xff]  ;;  %v208_v2 = vld [vmem:[%s1400_s1 + $0x8] sm:$0xff]  ;;  %v209_v3 = vld [vmem:[%s1400_s1 + $0x10] sm:$0xff] }
   0x2   :  { %v744_v4 = vpack.c.bf16 %v208_v2, %v207_v1  ;;  %v210_v5 = vld [vmem:[%s1400_s1 + $0x18] sm:$0xff]  ;;  %v211_v7 = vld [vmem:[%s1400_s1 + $0x20] sm:$0xff]  ;;  %v212_v8 = vld [vmem:[%s1400_s1 + $0x28] sm:$0xff] }
   0x3   :  { %v747_v6 = vpack.c.bf16 %v210_v5, %v209_v3  ;;  %v750_v9 = vpack.c.bf16 %v212_v8, %v211_v7  ;;  %v213_v10 = vld [vmem:[%s1400_s1 + $0x30] sm:$0xff]  ;;  %v214_v11 = vld [vmem:[%s1400_s1 + $0x38] sm:$0xff]  ;;  %v112_v12 = vld [vmem:[%s1401_s0 + $0x8] sm:$0xff] }
   0x4   :  { %745 = vmatpush1.bf16.msra.mxu0 %v744_v4  ;;  %807 = vmatpush1.bf16.msra.mxu1 %v744_v4  ;;  %v753_v13 = vpack.c.bf16 %v214_v11, %v213_v10  ;;  %v160_v14 = vld [vmem:[%s1401_s0 + $0x188] sm:$0xff]  ;;  %v215_v15 = vld [vmem:[%s1400_s1 + $0x40] sm:$0xff]  ;;  %v217_v18 = vld [vmem:[%s1400_s1 + $0x50] sm:$0xff] }
   0x5   :  { %746 = vmatprep.subr.bf16.mxu0 %v824_v0  ;;  %792 = vmatprep.subr.bf16.mxu1 %v824_v0  ;;  %v216_v16 = vld [vmem:[%s1400_s1 + $0x48] sm:$0xff]  ;;  %v218_v19 = vld [vmem:[%s1400_s1 + $0x58] sm:$0xff]  ;;  %v219_v21 = vld [vmem:[%s1400_s1 + $0x60] sm:$0xff] }
   0x6   :  { %303 = vmatprep.mubr.f32.mxu0 %v112_v12  ;;  %423 = vmatprep.mubr.f32.mxu1 %v160_v14  ;;  %v756_v17 = vpack.c.bf16 %v216_v16, %v215_v15  ;;  %v759_v20 = vpack.c.bf16 %v218_v19, %v217_v18  ;;  %v220_v22 = vld [vmem:[%s1400_s1 + $0x68] sm:$0xff]  ;;  %v221_v24 = vld [vmem:[%s1400_s1 + $0x70] sm:$0xff]  ;;  %v222_v25 = vld [vmem:[%s1400_s1 + $0x78] sm:$0xff] }
   0x7   :  { %v762_v23 = vpack.c.bf16 %v220_v22, %v219_v21  ;;  %v765_v26 = vpack.c.bf16 %v222_v25, %v221_v24  ;;  %v223_v27 = vld [vmem:[%s1400_s1 + $0x80] sm:$0xff]  ;;  %v224_v28 = vld [vmem:[%s1400_s1 + $0x88] sm:$0xff]  ;;  %v225_v30 = vld [vmem:[%s1400_s1 + $0x90] sm:$0xff] }
   0x8   :  { %748 = vmatpush1.bf16.msra.mxu0 %v747_v6  ;;  %808 = vmatpush1.bf16.msra.mxu1 %v747_v6  ;;  %v768_v29 = vpack.c.bf16 %v224_v28, %v223_v27  ;;  %v226_v31 = vld [vmem:[%s1400_s1 + $0x98] sm:$0xff]  ;;  %v227_v33 = vld [vmem:[%s1400_s1 + $0xa0] sm:$0xff]  ;;  %v228_v34 = vld [vmem:[%s1400_s1 + $0xa8] sm:$0xff] }
   0x9   :  { %749 = vmatprep.subr.bf16.mxu0 %v824_v0  ;;  %793 = vmatprep.subr.bf16.mxu1 %v824_v0  ;;  %v771_v32 = vpack.c.bf16 %v226_v31, %v225_v30  ;;  %v774_v35 = vpack.c.bf16 %v228_v34, %v227_v33  ;;  %v229_v36 = vld [vmem:[%s1400_s1 + $0xb0] sm:$0xff]  ;;  %v230_v37 = vld [vmem:[%s1400_s1 + $0xb8] sm:$0xff]  ;;  %v231_v39 = vld [vmem:[%s1400_s1 + $0xc0] sm:$0xff] }
   0xa   :  { %v777_v38 = vpack.c.bf16 %v230_v37, %v229_v36  ;;  %v232_v40 = vld [vmem:[%s1400_s1 + $0xc8] sm:$0xff]  ;;  %v233_v42 = vld [vmem:[%s1400_s1 + $0xd0] sm:$0xff]  ;;  %v234_v43 = vld [vmem:[%s1400_s1 + $0xd8] sm:$0xff] }
   0xb   :  { %v780_v41 = vpack.c.bf16 %v232_v40, %v231_v39  ;;  %v783_v44 = vpack.c.bf16 %v234_v43, %v233_v42  ;;  %v235_v45 = vld [vmem:[%s1400_s1 + $0xe0] sm:$0xff]  ;;  %v236_v46 = vld [vmem:[%s1400_s1 + $0xe8] sm:$0xff]  ;;  %v237_v48 = vld [vmem:[%s1400_s1 + $0xf0] sm:$0xff] }
   0xc   :  { %751 = vmatpush1.bf16.msra.mxu0 %v750_v9  ;;  %809 = vmatpush1.bf16.msra.mxu1 %v750_v9  ;;  %v786_v47 = vpack.c.bf16 %v236_v46, %v235_v45  ;;  %v238_v49 = vld [vmem:[%s1400_s1 + $0xf8] sm:$0xff]  ;;  %v111_v51 = vld [vmem:[%s1401_s0] sm:$0xff]  ;;  %v113_v55 = vld [vmem:[%s1401_s0 + $0x10] sm:$0xff] }
   0xd   :  { %752 = vmatprep.subr.bf16.mxu0 %v824_v0  ;;  %794 = vmatprep.subr.bf16.mxu1 %v824_v0  ;;  %v789_v50 = vpack.c.bf16 %v238_v49, %v237_v48  ;;  %v159_v52 = vld [vmem:[%s1401_s0 + $0x180] sm:$0xff]  ;;  %v114_v53 = vld [vmem:[%s1401_s0 + $0x18] sm:$0xff]  ;;  %v161_v56 = vld [vmem:[%s1401_s0 + $0x190] sm:$0xff] }
   0xe   :  { %v162_v54 = vld [vmem:[%s1401_s0 + $0x198] sm:$0xff]  ;;  %v116_v57 = vld [vmem:[%s1401_s0 + $0x28] sm:$0xff]  ;;  %v115_v59 = vld [vmem:[%s1401_s0 + $0x20] sm:$0xff] }
   0xf   :  { %v164_v58 = vld [vmem:[%s1401_s0 + $0x1a8] sm:$0xff]  ;;  %v163_v60 = vld [vmem:[%s1401_s0 + $0x1a0] sm:$0xff]  ;;  %v118_v61 = vld [vmem:[%s1401_s0 + $0x38] sm:$0xff] }
  0x10   :  { %754 = vmatpush1.bf16.msra.mxu0 %v753_v13  ;;  %810 = vmatpush1.bf16.msra.mxu1 %v753_v13  ;;  %v166_v62 = vld [vmem:[%s1401_s0 + $0x1b8] sm:$0xff]  ;;  %v117_v63 = vld [vmem:[%s1401_s0 + $0x30] sm:$0xff]  ;;  %v120_v1 = vld [vmem:[%s1401_s0 + $0x48] sm:$0xff] }
  0x11   :  { %755 = vmatprep.subr.bf16.mxu0 %v824_v0  ;;  %795 = vmatprep.subr.bf16.mxu1 %v824_v0  ;;  %v168_v2 = vld [vmem:[%s1401_s0 + $0x1c8] sm:$0xff]  ;;  %v119_v3 = vld [vmem:[%s1401_s0 + $0x40] sm:$0xff]  ;;  %v122_v5 = vld [vmem:[%s1401_s0 + $0x58] sm:$0xff] }
  0x12   :  { %v167_v4 = vld [vmem:[%s1401_s0 + $0x1c0] sm:$0xff]  ;;  %v170_v6 = vld [vmem:[%s1401_s0 + $0x1d8] sm:$0xff]  ;;  %v121_v7 = vld [vmem:[%s1401_s0 + $0x50] sm:$0xff] }
  0x13   :  { %v169_v8 = vld [vmem:[%s1401_s0 + $0x1d0] sm:$0xff]  ;;  %v124_v9 = vld [vmem:[%s1401_s0 + $0x68] sm:$0xff]  ;;  %v123_v11 = vld [vmem:[%s1401_s0 + $0x60] sm:$0xff] }
  0x14   :  { %757 = vmatpush1.bf16.msra.mxu0 %v756_v17  ;;  %811 = vmatpush1.bf16.msra.mxu1 %v756_v17  ;;  %v172_v10 = vld [vmem:[%s1401_s0 + $0x1e8] sm:$0xff]  ;;  %v171_v12 = vld [vmem:[%s1401_s0 + $0x1e0] sm:$0xff]  ;;  %v126_v13 = vld [vmem:[%s1401_s0 + $0x78] sm:$0xff] }
  0x15   :  { %758 = vmatprep.subr.bf16.mxu0 %v824_v0  ;;  %796 = vmatprep.subr.bf16.mxu1 %v824_v0  ;;  %v174_v14 = vld [vmem:[%s1401_s0 + $0x1f8] sm:$0xff]  ;;  %v125_v15 = vld [vmem:[%s1401_s0 + $0x70] sm:$0xff]  ;;  %v128_v17 = vld [vmem:[%s1401_s0 + $0x88] sm:$0xff] }
  0x16   :  { %v173_v16 = vld [vmem:[%s1401_s0 + $0x1f0] sm:$0xff]  ;;  %v176_v18 = vld [vmem:[%s1401_s0 + $0x208] sm:$0xff]  ;;  %v127_v19 = vld [vmem:[%s1401_s0 + $0x80] sm:$0xff] }
  0x17   :  { %v130_v21 = vld [vmem:[%s1401_s0 + $0x98] sm:$0xff]  ;;  %v177_v24 = vld [vmem:[%s1401_s0 + $0x210] sm:$0xff]  ;;  %v132_v25 = vld [vmem:[%s1401_s0 + $0xa8] sm:$0xff] }
  0x18   :  { %760 = vmatpush1.bf16.msra.mxu0 %v759_v20  ;;  %812 = vmatpush1.bf16.msra.mxu1 %v759_v20  ;;  %v175_v20 = vld [vmem:[%s1401_s0 + $0x200] sm:$0xff]  ;;  %v178_v22 = vld [vmem:[%s1401_s0 + $0x218] sm:$0xff]  ;;  %v133_v31 = vld [vmem:[%s1401_s0 + $0xb0] sm:$0xff] }
  0x19   :  { %761 = vmatprep.subr.bf16.mxu0 %v824_v0  ;;  %797 = vmatprep.subr.bf16.mxu1 %v824_v0  ;;  %v131_v27 = vld [vmem:[%s1401_s0 + $0xa0] sm:$0xff]  ;;  %v182_v30 = vld [vmem:[%s1401_s0 + $0x238] sm:$0xff]  ;;  %v136_v33 = vld [vmem:[%s1401_s0 + $0xc8] sm:$0xff] }
  0x1a   :  { %v179_v28 = vld [vmem:[%s1401_s0 + $0x220] sm:$0xff]  ;;  %v184_v34 = vld [vmem:[%s1401_s0 + $0x248] sm:$0xff]  ;;  %v138_v37 = vld [vmem:[%s1401_s0 + $0xd8] sm:$0xff] }
  0x1b   :  { %v183_v36 = vld [vmem:[%s1401_s0 + $0x240] sm:$0xff]  ;;  %v137_v39 = vld [vmem:[%s1401_s0 + $0xd0] sm:$0xff]  ;;  %v188_v42 = vld [vmem:[%s1401_s0 + $0x268] sm:$0xff] }
  0x1c   :  { %763 = vmatpush1.bf16.msra.mxu0 %v762_v23  ;;  %813 = vmatpush1.bf16.msra.mxu1 %v762_v23  ;;  %v129_v23 = vld [vmem:[%s1401_s0 + $0x90] sm:$0xff]  ;;  %v139_v43 = vld [vmem:[%s1401_s0 + $0xe0] sm:$0xff]  ;;  %v142_v45 = vld [vmem:[%s1401_s0 + $0xf8] sm:$0xff] }
  0x1d   :  { %764 = vmatprep.subr.bf16.mxu0 %v824_v0  ;;  %798 = vmatprep.subr.bf16.mxu1 %v824_v0  ;;  %v185_v40 = vld [vmem:[%s1401_s0 + $0x250] sm:$0xff]  ;;  %v190_v46 = vld [vmem:[%s1401_s0 + $0x278] sm:$0xff]  ;;  %v144_v49 = vld [vmem:[%s1401_s0 + $0x108] sm:$0xff] }
  0x1e   :  { %v189_v48 = vld [vmem:[%s1401_s0 + $0x270] sm:$0xff] }
  0x20   :  { %766 = vmatpush1.bf16.msra.mxu0 %v765_v26  ;;  %814 = vmatpush1.bf16.msra.mxu1 %v765_v26  ;;  %v180_v26 = vld [vmem:[%s1401_s0 + $0x228] sm:$0xff] }
  0x21   :  { %767 = vmatprep.subr.bf16.mxu0 %v824_v0  ;;  %799 = vmatprep.subr.bf16.mxu1 %v824_v0 }
  0x24   :  { %769 = vmatpush1.bf16.msra.mxu0 %v768_v29  ;;  %815 = vmatpush1.bf16.msra.mxu1 %v768_v29  ;;  %v134_v29 = vld [vmem:[%s1401_s0 + $0xb8] sm:$0xff] }
  0x25   :  { %770 = vmatprep.subr.bf16.mxu0 %v824_v0  ;;  %800 = vmatprep.subr.bf16.mxu1 %v824_v0 }
  0x28   :  { %772 = vmatpush1.bf16.msra.mxu0 %v771_v32  ;;  %816 = vmatpush1.bf16.msra.mxu1 %v771_v32  ;;  %v181_v32 = vld [vmem:[%s1401_s0 + $0x230] sm:$0xff] }
  0x29   :  { %773 = vmatprep.subr.bf16.mxu0 %v824_v0  ;;  %801 = vmatprep.subr.bf16.mxu1 %v824_v0 }
  0x2c   :  { %775 = vmatpush1.bf16.msra.mxu0 %v774_v35  ;;  %817 = vmatpush1.bf16.msra.mxu1 %v774_v35  ;;  %v135_v35 = vld [vmem:[%s1401_s0 + $0xc0] sm:$0xff] }
  0x2d   :  { %776 = vmatprep.subr.bf16.mxu0 %v824_v0  ;;  %802 = vmatprep.subr.bf16.mxu1 %v824_v0 }
  0x30   :  { %778 = vmatpush1.bf16.msra.mxu0 %v777_v38  ;;  %818 = vmatpush1.bf16.msra.mxu1 %v777_v38  ;;  %v186_v38 = vld [vmem:[%s1401_s0 + $0x258] sm:$0xff] }
  0x31   :  { %779 = vmatprep.subr.bf16.mxu0 %v824_v0  ;;  %803 = vmatprep.subr.bf16.mxu1 %v824_v0 }
  0x34   :  { %781 = vmatpush1.bf16.msra.mxu0 %v780_v41  ;;  %819 = vmatpush1.bf16.msra.mxu1 %v780_v41  ;;  %v140_v41 = vld [vmem:[%s1401_s0 + $0xe8] sm:$0xff] }
  0x35   :  { %782 = vmatprep.subr.bf16.mxu0 %v824_v0  ;;  %804 = vmatprep.subr.bf16.mxu1 %v824_v0 }
  0x38   :  { %784 = vmatpush1.bf16.msra.mxu0 %v783_v44  ;;  %820 = vmatpush1.bf16.msra.mxu1 %v783_v44  ;;  %v187_v44 = vld [vmem:[%s1401_s0 + $0x260] sm:$0xff] }
  0x39   :  { %785 = vmatprep.subr.bf16.mxu0 %v824_v0  ;;  %805 = vmatprep.subr.bf16.mxu1 %v824_v0 }
  0x3c   :  { %787 = vmatpush1.bf16.msra.mxu0 %v786_v47  ;;  %821 = vmatpush1.bf16.msra.mxu1 %v786_v47  ;;  %v141_v47 = vld [vmem:[%s1401_s0 + $0xf0] sm:$0xff] }
  0x3d   :  { %788 = vmatprep.subr.bf16.mxu0 %v824_v0  ;;  %806 = vmatprep.subr.bf16.mxu1 %v824_v0  ;;  %v165_v0 = vld [vmem:[%s1401_s0 + $0x1b0] sm:$0xff] }
  0x40   :  { %790 = vmatpush1.bf16.msra.mxu0 %v789_v50  ;;  %822 = vmatpush1.bf16.msra.mxu1 %v789_v50  ;;  %v192_v50 = vld [vmem:[%s1401_s0 + $0x288] sm:$0xff] }
  0x43   :  { %304 = vmatmul.mubr.f32.vlgmr.msra.gmra.mrb[0].mxu0 %v111_v51  ;;  %424 = vmatmul.mubr.f32.vlgmr.msra.gmra.mrb[0].mxu1 %v159_v52  ;;  %v143_v51 = vld [vmem:[%s1401_s0 + $0x100] sm:$0xff] }
  0x44   :  { %308 = vmatprep.mubr.f32.mxu0 %v114_v53  ;;  %428 = vmatprep.mubr.f32.mxu1 %v162_v54  ;;  %v191_v52 = vld [vmem:[%s1401_s0 + $0x280] sm:$0xff]  ;;  %v146_v53 = vld [vmem:[%s1401_s0 + $0x118] sm:$0xff] }
  0x45   :  { %v194_v54 = vld [vmem:[%s1401_s0 + $0x298] sm:$0xff] }
  0x47   :  { %309 = vmatmul.mubr.f32.gmra.mrb[2].mxu0 %v113_v55  ;;  %429 = vmatmul.mubr.f32.gmra.mrb[2].mxu1 %v161_v56  ;;  %v145_v55 = vld [vmem:[%s1401_s0 + $0x110] sm:$0xff] }
  0x48   :  { %313 = vmatprep.mubr.f32.mxu0 %v116_v57  ;;  %433 = vmatprep.mubr.f32.mxu1 %v164_v58  ;;  %v193_v56 = vld [vmem:[%s1401_s0 + $0x290] sm:$0xff]  ;;  %v148_v57 = vld [vmem:[%s1401_s0 + $0x128] sm:$0xff] }
  0x49   :  { %v196_v58 = vld [vmem:[%s1401_s0 + $0x2a8] sm:$0xff] }
  0x4b   :  { %314 = vmatmul.mubr.f32.gmra.mrb[4].mxu0 %v115_v59  ;;  %434 = vmatmul.mubr.f32.gmra.mrb[4].mxu1 %v163_v60  ;;  %v147_v59 = vld [vmem:[%s1401_s0 + $0x120] sm:$0xff] }
  0x4c   :  { %318 = vmatprep.mubr.f32.mxu0 %v118_v61  ;;  %438 = vmatprep.mubr.f32.mxu1 %v166_v62  ;;  %v195_v60 = vld [vmem:[%s1401_s0 + $0x2a0] sm:$0xff]  ;;  %v150_v61 = vld [vmem:[%s1401_s0 + $0x138] sm:$0xff] }
  0x4d   :  { %v198_v62 = vld [vmem:[%s1401_s0 + $0x2b8] sm:$0xff] }
  0x4f   :  { %319 = vmatmul.mubr.f32.gmra.mrb[6].mxu0 %v117_v63  ;;  %439 = vmatmul.mubr.f32.gmra.mrb[6].mxu1 %v165_v0  ;;  %v149_v63 = vld [vmem:[%s1401_s0 + $0x130] sm:$0xff] }
  0x50   :  { %323 = vmatprep.mubr.f32.mxu0 %v120_v1  ;;  %443 = vmatprep.mubr.f32.mxu1 %v168_v2  ;;  %v197_v0 = vld [vmem:[%s1401_s0 + $0x2b0] sm:$0xff]  ;;  %v152_v1 = vld [vmem:[%s1401_s0 + $0x148] sm:$0xff] }
  0x51   :  { %v200_v2 = vld [vmem:[%s1401_s0 + $0x2c8] sm:$0xff] }
  0x53   :  { %324 = vmatmul.mubr.f32.gmra.mrb[8].mxu0 %v119_v3  ;;  %444 = vmatmul.mubr.f32.gmra.mrb[8].mxu1 %v167_v4  ;;  %v151_v3 = vld [vmem:[%s1401_s0 + $0x140] sm:$0xff] }
  0x54   :  { %328 = vmatprep.mubr.f32.mxu0 %v122_v5  ;;  %448 = vmatprep.mubr.f32.mxu1 %v170_v6  ;;  %v199_v4 = vld [vmem:[%s1401_s0 + $0x2c0] sm:$0xff]  ;;  %v154_v5 = vld [vmem:[%s1401_s0 + $0x158] sm:$0xff] }
  0x55   :  { %v202_v6 = vld [vmem:[%s1401_s0 + $0x2d8] sm:$0xff] }
  0x57   :  { %329 = vmatmul.mubr.f32.gmra.mrb[10].mxu0 %v121_v7  ;;  %449 = vmatmul.mubr.f32.gmra.mrb[10].mxu1 %v169_v8  ;;  %v153_v7 = vld [vmem:[%s1401_s0 + $0x150] sm:$0xff] }
  0x58   :  { %333 = vmatprep.mubr.f32.mxu0 %v124_v9  ;;  %453 = vmatprep.mubr.f32.mxu1 %v172_v10  ;;  %v201_v8 = vld [vmem:[%s1401_s0 + $0x2d0] sm:$0xff]  ;;  %v156_v9 = vld [vmem:[%s1401_s0 + $0x168] sm:$0xff] }
  0x59   :  { %v204_v10 = vld [vmem:[%s1401_s0 + $0x2e8] sm:$0xff] }
  0x5b   :  { %334 = vmatmul.mubr.f32.gmra.mrb[12].mxu0 %v123_v11  ;;  %454 = vmatmul.mubr.f32.gmra.mrb[12].mxu1 %v171_v12  ;;  %v155_v11 = vld [vmem:[%s1401_s0 + $0x160] sm:$0xff] }
  0x5c   :  { %338 = vmatprep.mubr.f32.mxu0 %v126_v13  ;;  %458 = vmatprep.mubr.f32.mxu1 %v174_v14  ;;  %v203_v12 = vld [vmem:[%s1401_s0 + $0x2e0] sm:$0xff]  ;;  %v158_v13 = vld [vmem:[%s1401_s0 + $0x178] sm:$0xff] }
  0x5d   :  { %v206_v14 = vld [vmem:[%s1401_s0 + $0x2f8] sm:$0xff] }
  0x5f   :  { %339 = vmatmul.mubr.f32.gmra.mrb[14].mxu0 %v125_v15  ;;  %459 = vmatmul.mubr.f32.gmra.mrb[14].mxu1 %v173_v16  ;;  %v157_v15 = vld [vmem:[%s1401_s0 + $0x170] sm:$0xff] }
  0x60   :  { %343 = vmatprep.mubr.f32.mxu0 %v128_v17  ;;  %463 = vmatprep.mubr.f32.mxu1 %v176_v18  ;;  %v205_v16 = vld [vmem:[%s1401_s0 + $0x2f0] sm:$0xff] }
  0x63   :  { %344 = vmatmul.mubr.f32.gmra.mrb[16].mxu0 %v127_v19  ;;  %464 = vmatmul.mubr.f32.gmra.mrb[16].mxu1 %v175_v20 }
  0x64   :  { %348 = vmatprep.mubr.f32.mxu0 %v130_v21  ;;  %468 = vmatprep.mubr.f32.mxu1 %v178_v22 }
  0x67   :  { %349 = vmatmul.mubr.f32.gmra.mrb[18].mxu0 %v129_v23  ;;  %469 = vmatmul.mubr.f32.gmra.mrb[18].mxu1 %v177_v24 }
  0x68   :  { %353 = vmatprep.mubr.f32.mxu0 %v132_v25  ;;  %473 = vmatprep.mubr.f32.mxu1 %v180_v26 }
  0x6b   :  { %354 = vmatmul.mubr.f32.gmra.mrb[20].mxu0 %v131_v27  ;;  %474 = vmatmul.mubr.f32.gmra.mrb[20].mxu1 %v179_v28 }
  0x6c   :  { %358 = vmatprep.mubr.f32.mxu0 %v134_v29  ;;  %478 = vmatprep.mubr.f32.mxu1 %v182_v30 }
  0x6f   :  { %359 = vmatmul.mubr.f32.gmra.mrb[22].mxu0 %v133_v31  ;;  %479 = vmatmul.mubr.f32.gmra.mrb[22].mxu1 %v181_v32 }
  0x70   :  { %363 = vmatprep.mubr.f32.mxu0 %v136_v33  ;;  %483 = vmatprep.mubr.f32.mxu1 %v184_v34 }
  0x73   :  { %364 = vmatmul.mubr.f32.gmra.mrb[24].mxu0 %v135_v35  ;;  %484 = vmatmul.mubr.f32.gmra.mrb[24].mxu1 %v183_v36 }
  0x74   :  { %368 = vmatprep.mubr.f32.mxu0 %v138_v37  ;;  %488 = vmatprep.mubr.f32.mxu1 %v186_v38 }
  0x77   :  { %369 = vmatmul.mubr.f32.gmra.mrb[26].mxu0 %v137_v39  ;;  %489 = vmatmul.mubr.f32.gmra.mrb[26].mxu1 %v185_v40 }
  0x78   :  { %373 = vmatprep.mubr.f32.mxu0 %v140_v41  ;;  %493 = vmatprep.mubr.f32.mxu1 %v188_v42 }
  0x7b   :  { %374 = vmatmul.mubr.f32.gmra.mrb[28].mxu0 %v139_v43  ;;  %494 = vmatmul.mubr.f32.gmra.mrb[28].mxu1 %v187_v44 }
  0x7c   :  { %378 = vmatprep.mubr.f32.mxu0 %v142_v45  ;;  %498 = vmatprep.mubr.f32.mxu1 %v190_v46 }
  0x7f   :  { %379 = vmatmul.mubr.f32.gmra.mrb[30].mxu0 %v141_v47  ;;  %499 = vmatmul.mubr.f32.gmra.mrb[30].mxu1 %v189_v48 }
  0x80   :  { %383 = vmatprep.mubr.f32.mxu0 %v144_v49  ;;  %503 = vmatprep.mubr.f32.mxu1 %v192_v50 }
  0x83   :  { %384 = vmatmul.mubr.f32.gmra.mrb[32].mxu0 %v143_v51  ;;  %504 = vmatmul.mubr.f32.gmra.mrb[32].mxu1 %v191_v52 }
  0x84   :  { %388 = vmatprep.mubr.f32.mxu0 %v146_v53  ;;  %508 = vmatprep.mubr.f32.mxu1 %v194_v54 }
  0x87   :  { %389 = vmatmul.mubr.f32.gmra.mrb[34].mxu0 %v145_v55  ;;  %509 = vmatmul.mubr.f32.gmra.mrb[34].mxu1 %v193_v56 }
  0x88   :  { %393 = vmatprep.mubr.f32.mxu0 %v148_v57  ;;  %513 = vmatprep.mubr.f32.mxu1 %v196_v58 }
  0x8b   :  { %394 = vmatmul.mubr.f32.gmra.mrb[36].mxu0 %v147_v59  ;;  %514 = vmatmul.mubr.f32.gmra.mrb[36].mxu1 %v195_v60 }
  0x8c   :  { %398 = vmatprep.mubr.f32.mxu0 %v150_v61  ;;  %518 = vmatprep.mubr.f32.mxu1 %v198_v62 }
  0x8f   :  { %399 = vmatmul.mubr.f32.gmra.mrb[38].mxu0 %v149_v63  ;;  %519 = vmatmul.mubr.f32.gmra.mrb[38].mxu1 %v197_v0 }
  0x90   :  { %403 = vmatprep.mubr.f32.mxu0 %v152_v1  ;;  %523 = vmatprep.mubr.f32.mxu1 %v200_v2 }
  0x93   :  { %404 = vmatmul.mubr.f32.gmra.mrb[40].mxu0 %v151_v3  ;;  %524 = vmatmul.mubr.f32.gmra.mrb[40].mxu1 %v199_v4 }
  0x94   :  { %408 = vmatprep.mubr.f32.mxu0 %v154_v5  ;;  %528 = vmatprep.mubr.f32.mxu1 %v202_v6 }
  0x97   :  { %409 = vmatmul.mubr.f32.gmra.mrb[42].mxu0 %v153_v7  ;;  %529 = vmatmul.mubr.f32.gmra.mrb[42].mxu1 %v201_v8 }
  0x98   :  { %413 = vmatprep.mubr.f32.mxu0 %v156_v9  ;;  %533 = vmatprep.mubr.f32.mxu1 %v204_v10 }
  0x9b   :  { %414 = vmatmul.mubr.f32.gmra.mrb[44].mxu0 %v155_v11  ;;  %534 = vmatmul.mubr.f32.gmra.mrb[44].mxu1 %v203_v12 }
  0x9c   :  { %418 = vmatprep.mubr.f32.mxu0 %v158_v13  ;;  %538 = vmatprep.mubr.f32.mxu1 %v206_v14 }
  0x9f   :  { %419 = vmatmul.mubr.f32.gmra.mrb[46].mxu0 %v157_v15  ;;  %539 = vmatmul.mubr.f32.gmra.mrb[46].mxu1 %v205_v16 }
 0x116   :  { %v305_v17 = vpop.f32.mrb[0].mxu0  ;;  %v425_v18 = vpop.f32.mrb[0].mxu1 }
 0x117   :  { %691 = vst [vmem:[%s1402_s2] sm:$0xff] %v305_v17  ;;  %715 = vst [vmem:[%s1402_s2 + $0xc0] sm:$0xff] %v425_v18  ;;  %v307_v19 = vpop.f32.mrb[1].mxu0  ;;  %v427_v20 = vpop.f32.mrb[1].mxu1 }
 0x11a   :  { %v310_v21 = vpop.f32.mrb[2].mxu0  ;;  %v430_v22 = vpop.f32.mrb[2].mxu1 }
 0x11b   :  { %692 = vst [vmem:[%s1402_s2 + $0x8] sm:$0xff] %v310_v21  ;;  %716 = vst [vmem:[%s1402_s2 + $0xc8] sm:$0xff] %v430_v22  ;;  %v312_v23 = vpop.f32.mrb[3].mxu0  ;;  %v432_v24 = vpop.f32.mrb[3].mxu1 }
 0x11e   :  { %v315_v25 = vpop.f32.mrb[4].mxu0  ;;  %v435_v26 = vpop.f32.mrb[4].mxu1 }
 0x11f   :  { %693 = vst [vmem:[%s1402_s2 + $0x10] sm:$0xff] %v315_v25  ;;  %717 = vst [vmem:[%s1402_s2 + $0xd0] sm:$0xff] %v435_v26  ;;  %v317_v27 = vpop.f32.mrb[5].mxu0  ;;  %v437_v28 = vpop.f32.mrb[5].mxu1 }
 0x122   :  { %v320_v29 = vpop.f32.mrb[6].mxu0  ;;  %v440_v30 = vpop.f32.mrb[6].mxu1 }
 0x123   :  { %694 = vst [vmem:[%s1402_s2 + $0x18] sm:$0xff] %v320_v29  ;;  %718 = vst [vmem:[%s1402_s2 + $0xd8] sm:$0xff] %v440_v30  ;;  %v322_v31 = vpop.f32.mrb[7].mxu0  ;;  %v442_v32 = vpop.f32.mrb[7].mxu1 }
 0x126   :  { %v325_v33 = vpop.f32.mrb[8].mxu0  ;;  %v445_v34 = vpop.f32.mrb[8].mxu1 }
 0x127   :  { %695 = vst [vmem:[%s1402_s2 + $0x20] sm:$0xff] %v325_v33  ;;  %719 = vst [vmem:[%s1402_s2 + $0xe0] sm:$0xff] %v445_v34  ;;  %v327_v35 = vpop.f32.mrb[9].mxu0  ;;  %v447_v36 = vpop.f32.mrb[9].mxu1 }
 0x12a   :  { %v330_v37 = vpop.f32.mrb[10].mxu0  ;;  %v450_v38 = vpop.f32.mrb[10].mxu1 }
 0x12b   :  { %696 = vst [vmem:[%s1402_s2 + $0x28] sm:$0xff] %v330_v37  ;;  %720 = vst [vmem:[%s1402_s2 + $0xe8] sm:$0xff] %v450_v38  ;;  %v332_v39 = vpop.f32.mrb[11].mxu0  ;;  %v452_v40 = vpop.f32.mrb[11].mxu1 }
 0x12e   :  { %v335_v41 = vpop.f32.mrb[12].mxu0  ;;  %v455_v42 = vpop.f32.mrb[12].mxu1 }
 0x12f   :  { %697 = vst [vmem:[%s1402_s2 + $0x30] sm:$0xff] %v335_v41  ;;  %721 = vst [vmem:[%s1402_s2 + $0xf0] sm:$0xff] %v455_v42  ;;  %v337_v43 = vpop.f32.mrb[13].mxu0  ;;  %v457_v44 = vpop.f32.mrb[13].mxu1 }
 0x132   :  { %v340_v45 = vpop.f32.mrb[14].mxu0  ;;  %v460_v46 = vpop.f32.mrb[14].mxu1 }
 0x133   :  { %698 = vst [vmem:[%s1402_s2 + $0x38] sm:$0xff] %v340_v45  ;;  %722 = vst [vmem:[%s1402_s2 + $0xf8] sm:$0xff] %v460_v46  ;;  %v342_v47 = vpop.f32.mrb[15].mxu0  ;;  %v462_v48 = vpop.f32.mrb[15].mxu1 }
 0x136   :  { %v345_v49 = vpop.f32.mrb[16].mxu0  ;;  %v465_v50 = vpop.f32.mrb[16].mxu1 }
 0x137   :  { %699 = vst [vmem:[%s1402_s2 + $0x40] sm:$0xff] %v345_v49  ;;  %723 = vst [vmem:[%s1402_s2 + $0x100] sm:$0xff] %v465_v50  ;;  %v347_v51 = vpop.f32.mrb[17].mxu0  ;;  %v467_v52 = vpop.f32.mrb[17].mxu1 }
 0x13a   :  { %v350_v53 = vpop.f32.mrb[18].mxu0  ;;  %v470_v54 = vpop.f32.mrb[18].mxu1 }
 0x13b   :  { %700 = vst [vmem:[%s1402_s2 + $0x48] sm:$0xff] %v350_v53  ;;  %724 = vst [vmem:[%s1402_s2 + $0x108] sm:$0xff] %v470_v54  ;;  %v352_v55 = vpop.f32.mrb[19].mxu0  ;;  %v472_v56 = vpop.f32.mrb[19].mxu1 }
 0x13e   :  { %v355_v57 = vpop.f32.mrb[20].mxu0  ;;  %v475_v58 = vpop.f32.mrb[20].mxu1 }
 0x13f   :  { %701 = vst [vmem:[%s1402_s2 + $0x50] sm:$0xff] %v355_v57  ;;  %725 = vst [vmem:[%s1402_s2 + $0x110] sm:$0xff] %v475_v58  ;;  %v357_v59 = vpop.f32.mrb[21].mxu0  ;;  %v477_v60 = vpop.f32.mrb[21].mxu1 }
 0x142   :  { %v360_v61 = vpop.f32.mrb[22].mxu0  ;;  %v480_v62 = vpop.f32.mrb[22].mxu1 }
 0x143   :  { %702 = vst [vmem:[%s1402_s2 + $0x58] sm:$0xff] %v360_v61  ;;  %726 = vst [vmem:[%s1402_s2 + $0x118] sm:$0xff] %v480_v62  ;;  %v362_v63 = vpop.f32.mrb[23].mxu0  ;;  %v482_v0 = vpop.f32.mrb[23].mxu1 }
 0x146   :  { %v365_v1 = vpop.f32.mrb[24].mxu0  ;;  %v485_v2 = vpop.f32.mrb[24].mxu1 }
 0x147   :  { %703 = vst [vmem:[%s1402_s2 + $0x60] sm:$0xff] %v365_v1  ;;  %727 = vst [vmem:[%s1402_s2 + $0x120] sm:$0xff] %v485_v2  ;;  %v367_v3 = vpop.f32.mrb[25].mxu0  ;;  %v487_v4 = vpop.f32.mrb[25].mxu1 }
 0x14a   :  { %v370_v5 = vpop.f32.mrb[26].mxu0  ;;  %v490_v6 = vpop.f32.mrb[26].mxu1 }
 0x14b   :  { %704 = vst [vmem:[%s1402_s2 + $0x68] sm:$0xff] %v370_v5  ;;  %728 = vst [vmem:[%s1402_s2 + $0x128] sm:$0xff] %v490_v6  ;;  %v372_v7 = vpop.f32.mrb[27].mxu0  ;;  %v492_v8 = vpop.f32.mrb[27].mxu1 }
 0x14e   :  { %v375_v9 = vpop.f32.mrb[28].mxu0  ;;  %v495_v10 = vpop.f32.mrb[28].mxu1 }
 0x14f   :  { %705 = vst [vmem:[%s1402_s2 + $0x70] sm:$0xff] %v375_v9  ;;  %729 = vst [vmem:[%s1402_s2 + $0x130] sm:$0xff] %v495_v10  ;;  %v377_v11 = vpop.f32.mrb[29].mxu0  ;;  %v497_v12 = vpop.f32.mrb[29].mxu1 }
 0x152   :  { %v380_v13 = vpop.f32.mrb[30].mxu0  ;;  %v500_v14 = vpop.f32.mrb[30].mxu1 }
 0x153   :  { %706 = vst [vmem:[%s1402_s2 + $0x78] sm:$0xff] %v380_v13  ;;  %730 = vst [vmem:[%s1402_s2 + $0x138] sm:$0xff] %v500_v14  ;;  %v382_v15 = vpop.f32.mrb[31].mxu0  ;;  %v502_v16 = vpop.f32.mrb[31].mxu1 }
 0x156   :  { %v385_v17 = vpop.f32.mrb[32].mxu0  ;;  %v505_v18 = vpop.f32.mrb[32].mxu1 }
 0x157   :  { %707 = vst [vmem:[%s1402_s2 + $0x80] sm:$0xff] %v385_v17  ;;  %731 = vst [vmem:[%s1402_s2 + $0x140] sm:$0xff] %v505_v18  ;;  %v387_v19 = vpop.f32.mrb[33].mxu0  ;;  %v507_v20 = vpop.f32.mrb[33].mxu1 }
 0x15a   :  { %v390_v21 = vpop.f32.mrb[34].mxu0  ;;  %v510_v22 = vpop.f32.mrb[34].mxu1 }
 0x15b   :  { %708 = vst [vmem:[%s1402_s2 + $0x88] sm:$0xff] %v390_v21  ;;  %732 = vst [vmem:[%s1402_s2 + $0x148] sm:$0xff] %v510_v22  ;;  %v392_v23 = vpop.f32.mrb[35].mxu0  ;;  %v512_v24 = vpop.f32.mrb[35].mxu1 }
 0x15e   :  { %v395_v25 = vpop.f32.mrb[36].mxu0  ;;  %v515_v26 = vpop.f32.mrb[36].mxu1 }
 0x15f   :  { %709 = vst [vmem:[%s1402_s2 + $0x90] sm:$0xff] %v395_v25  ;;  %733 = vst [vmem:[%s1402_s2 + $0x150] sm:$0xff] %v515_v26  ;;  %v397_v27 = vpop.f32.mrb[37].mxu0  ;;  %v517_v28 = vpop.f32.mrb[37].mxu1 }
 0x162   :  { %v400_v29 = vpop.f32.mrb[38].mxu0  ;;  %v520_v30 = vpop.f32.mrb[38].mxu1 }
 0x163   :  { %710 = vst [vmem:[%s1402_s2 + $0x98] sm:$0xff] %v400_v29  ;;  %734 = vst [vmem:[%s1402_s2 + $0x158] sm:$0xff] %v520_v30  ;;  %v402_v31 = vpop.f32.mrb[39].mxu0  ;;  %v522_v32 = vpop.f32.mrb[39].mxu1 }
 0x166   :  { %v405_v33 = vpop.f32.mrb[40].mxu0  ;;  %v525_v34 = vpop.f32.mrb[40].mxu1 }
 0x167   :  { %711 = vst [vmem:[%s1402_s2 + $0xa0] sm:$0xff] %v405_v33  ;;  %735 = vst [vmem:[%s1402_s2 + $0x160] sm:$0xff] %v525_v34  ;;  %v407_v35 = vpop.f32.mrb[41].mxu0  ;;  %v527_v36 = vpop.f32.mrb[41].mxu1 }
 0x16a   :  { %v410_v37 = vpop.f32.mrb[42].mxu0  ;;  %v530_v38 = vpop.f32.mrb[42].mxu1 }
 0x16b   :  { %712 = vst [vmem:[%s1402_s2 + $0xa8] sm:$0xff] %v410_v37  ;;  %736 = vst [vmem:[%s1402_s2 + $0x168] sm:$0xff] %v530_v38  ;;  %v412_v39 = vpop.f32.mrb[43].mxu0  ;;  %v532_v40 = vpop.f32.mrb[43].mxu1 }
 0x16e   :  { %v415_v41 = vpop.f32.mrb[44].mxu0  ;;  %v535_v42 = vpop.f32.mrb[44].mxu1 }
 0x16f   :  { %713 = vst [vmem:[%s1402_s2 + $0xb0] sm:$0xff] %v415_v41  ;;  %737 = vst [vmem:[%s1402_s2 + $0x170] sm:$0xff] %v535_v42  ;;  %v417_v43 = vpop.f32.mrb[45].mxu0  ;;  %v537_v44 = vpop.f32.mrb[45].mxu1 }
 0x172   :  { %v420_v45 = vpop.f32.mrb[46].mxu0  ;;  %v540_v46 = vpop.f32.mrb[46].mxu1 }
 0x173   :  { %714 = vst [vmem:[%s1402_s2 + $0xb8] sm:$0xff] %v420_v45  ;;  %738 = vst [vmem:[%s1402_s2 + $0x178] sm:$0xff] %v540_v46  ;;  %v422_v47 = vpop.f32.mrb[47].mxu0  ;;  %v542_v48 = vpop.f32.mrb[47].mxu1 }

// kernel: graph_convolution.3
= control target key start
LH: loop header
LB: loop body
LE: loop exit
PB: predicated region body
PF: predicated region fallthrough
CT: control target
= control target key end

     0   :  { %v1452_v0 = vmov 0.0|0.0   ;;  %s2326_s1 = inlined_call_operand.vmem [shape: f32[384,128], index: 1, kind: input, shape index: {}]   ;;  %s2327_s0 = inlined_call_operand.vmem [shape: f32[384,384], index: 0, kind: input, shape index: {}]   ;;  %s2328_s2 = inlined_call_operand.vmem [shape: f32[1,128], index: 2, kind: input, shape index: {}]   ;;  %s2329_s3 = inlined_call_operand.vmem [shape: f32[384,128], index: 3, kind: output, shape index: {}]  }
   0x1   :  { %1339 = vmatprep.subr.bf16.mxu0 %v1452_v0  ;;  %1419 = vmatprep.subr.bf16.mxu1 %v1452_v0  ;;  %v258_v1 = vld [vmem:[%s2326_s1] sm:$0xff]  ;;  %v259_v2 = vld [vmem:[%s2326_s1 + $0x8] sm:$0xff]  ;;  %v260_v3 = vld [vmem:[%s2326_s1 + $0x10] sm:$0xff] }
   0x2   :  { %v1340_v4 = vpack.c.bf16 %v259_v2, %v258_v1  ;;  %v261_v5 = vld [vmem:[%s2326_s1 + $0x18] sm:$0xff]  ;;  %v262_v7 = vld [vmem:[%s2326_s1 + $0x20] sm:$0xff]  ;;  %v263_v8 = vld [vmem:[%s2326_s1 + $0x28] sm:$0xff] }
   0x3   :  { %v1343_v6 = vpack.c.bf16 %v261_v5, %v260_v3  ;;  %v1346_v9 = vpack.c.bf16 %v263_v8, %v262_v7  ;;  %v264_v10 = vld [vmem:[%s2326_s1 + $0x30] sm:$0xff]  ;;  %v265_v11 = vld [vmem:[%s2326_s1 + $0x38] sm:$0xff]  ;;  %v115_v12 = vld [vmem:[%s2327_s0 + $0x8] sm:$0xff] }
   0x4   :  { %1341 = vmatpush1.bf16.msra.mxu0 %v1340_v4  ;;  %1435 = vmatpush1.bf16.msra.mxu1 %v1340_v4  ;;  %v1349_v13 = vpack.c.bf16 %v265_v11, %v264_v10  ;;  %v223_v14 = vld [vmem:[%s2327_s0 + $0x368] sm:$0xff]  ;;  %v266_v15 = vld [vmem:[%s2326_s1 + $0x40] sm:$0xff]  ;;  %v268_v18 = vld [vmem:[%s2326_s1 + $0x50] sm:$0xff] }
   0x5   :  { %1342 = vmatprep.subr.bf16.mxu0 %v1452_v0  ;;  %1420 = vmatprep.subr.bf16.mxu1 %v1452_v0  ;;  %v267_v16 = vld [vmem:[%s2326_s1 + $0x48] sm:$0xff]  ;;  %v269_v19 = vld [vmem:[%s2326_s1 + $0x58] sm:$0xff]  ;;  %v270_v21 = vld [vmem:[%s2326_s1 + $0x60] sm:$0xff] }
   0x6   :  { %370 = vmatprep.mubr.f32.mxu0 %v115_v12  ;;  %550 = vmatprep.mubr.f32.mxu1 %v223_v14  ;;  %v1352_v17 = vpack.c.bf16 %v267_v16, %v266_v15  ;;  %v1355_v20 = vpack.c.bf16 %v269_v19, %v268_v18  ;;  %v271_v22 = vld [vmem:[%s2326_s1 + $0x68] sm:$0xff]  ;;  %v272_v24 = vld [vmem:[%s2326_s1 + $0x70] sm:$0xff]  ;;  %v273_v25 = vld [vmem:[%s2326_s1 + $0x78] sm:$0xff] }
   0x7   :  { %v1358_v23 = vpack.c.bf16 %v271_v22, %v270_v21  ;;  %v1361_v26 = vpack.c.bf16 %v273_v25, %v272_v24  ;;  %v274_v27 = vld [vmem:[%s2326_s1 + $0x80] sm:$0xff]  ;;  %v275_v28 = vld [vmem:[%s2326_s1 + $0x88] sm:$0xff]  ;;  %v276_v30 = vld [vmem:[%s2326_s1 + $0x90] sm:$0xff] }
   0x8   :  { %1344 = vmatpush1.bf16.msra.mxu0 %v1343_v6  ;;  %1436 = vmatpush1.bf16.msra.mxu1 %v1343_v6  ;;  %v1364_v29 = vpack.c.bf16 %v275_v28, %v274_v27  ;;  %v277_v31 = vld [vmem:[%s2326_s1 + $0x98] sm:$0xff]  ;;  %v278_v33 = vld [vmem:[%s2326_s1 + $0xa0] sm:$0xff]  ;;  %v279_v34 = vld [vmem:[%s2326_s1 + $0xa8] sm:$0xff] }
   0x9   :  { %1345 = vmatprep.subr.bf16.mxu0 %v1452_v0  ;;  %1421 = vmatprep.subr.bf16.mxu1 %v1452_v0  ;;  %v1367_v32 = vpack.c.bf16 %v277_v31, %v276_v30  ;;  %v1370_v35 = vpack.c.bf16 %v279_v34, %v278_v33  ;;  %v280_v36 = vld [vmem:[%s2326_s1 + $0xb0] sm:$0xff]  ;;  %v281_v37 = vld [vmem:[%s2326_s1 + $0xb8] sm:$0xff]  ;;  %v282_v39 = vld [vmem:[%s2326_s1 + $0xc0] sm:$0xff] }
   0xa   :  { %v1373_v38 = vpack.c.bf16 %v281_v37, %v280_v36  ;;  %v283_v40 = vld [vmem:[%s2326_s1 + $0xc8] sm:$0xff]  ;;  %v284_v42 = vld [vmem:[%s2326_s1 + $0xd0] sm:$0xff]  ;;  %v285_v43 = vld [vmem:[%s2326_s1 + $0xd8] sm:$0xff] }
   0xb   :  { %v1376_v41 = vpack.c.bf16 %v283_v40, %v282_v39  ;;  %v1379_v44 = vpack.c.bf16 %v285_v43, %v284_v42  ;;  %v286_v45 = vld [vmem:[%s2326_s1 + $0xe0] sm:$0xff]  ;;  %v287_v46 = vld [vmem:[%s2326_s1 + $0xe8] sm:$0xff]  ;;  %v288_v48 = vld [vmem:[%s2326_s1 + $0xf0] sm:$0xff] }
   0xc   :  { %1347 = vmatpush1.bf16.msra.mxu0 %v1346_v9  ;;  %1437 = vmatpush1.bf16.msra.mxu1 %v1346_v9  ;;  %v1382_v47 = vpack.c.bf16 %v287_v46, %v286_v45  ;;  %v289_v49 = vld [vmem:[%s2326_s1 + $0xf8] sm:$0xff]  ;;  %v290_v50 = vld [vmem:[%s2326_s1 + $0x100] sm:$0xff]  ;;  %v291_v51 = vld [vmem:[%s2326_s1 + $0x108] sm:$0xff] }
   0xd   :  { %1348 = vmatprep.subr.bf16.mxu0 %v1452_v0  ;;  %1422 = vmatprep.subr.bf16.mxu1 %v1452_v0  ;;  %v1385_v52 = vpack.c.bf16 %v289_v49, %v288_v48  ;;  %v1387_v53 = vpack.c.bf16 %v291_v51, %v290_v50  ;;  %v292_v54 = vld [vmem:[%s2326_s1 + $0x110] sm:$0xff]  ;;  %v293_v55 = vld [vmem:[%s2326_s1 + $0x118] sm:$0xff]  ;;  %v114_v56 = vld [vmem:[%s2327_s0] sm:$0xff] }
   0xe   :  { %v222_v57 = vld [vmem:[%s2327_s0 + $0x360] sm:$0xff]  ;;  %v1391_v59 = vpack.c.bf16 %v293_v55, %v292_v54  ;;  %v295_v62 = vld [vmem:[%s2326_s1 + $0x128] sm:$0xff]  ;;  %v117_v63 = vld [vmem:[%s2327_s0 + $0x18] sm:$0xff] }
   0xf   :  { %v118_v58 = vld [vmem:[%s2327_s0 + $0x20] sm:$0xff]  ;;  %v121_v1 = vld [vmem:[%s2327_s0 + $0x38] sm:$0xff]  ;;  %v296_v4 = vld [vmem:[%s2326_s1 + $0x130] sm:$0xff] }
  0x10   :  { %1350 = vmatpush1.bf16.msra.mxu0 %v1349_v13  ;;  %1438 = vmatpush1.bf16.msra.mxu1 %v1349_v13  ;;  %v226_v60 = vld [vmem:[%s2327_s0 + $0x380] sm:$0xff]  ;;  %v229_v2 = vld [vmem:[%s2327_s0 + $0x398] sm:$0xff]  ;;  %v120_v6 = vld [vmem:[%s2327_s0 + $0x30] sm:$0xff] }
  0x11   :  { %1351 = vmatprep.subr.bf16.mxu0 %v1452_v0  ;;  %1423 = vmatprep.subr.bf16.mxu1 %v1452_v0  ;;  %v294_v61 = vld [vmem:[%s2326_s1 + $0x120] sm:$0xff]  ;;  %v297_v5 = vld [vmem:[%s2326_s1 + $0x138] sm:$0xff]  ;;  %v228_v7 = vld [vmem:[%s2327_s0 + $0x390] sm:$0xff] }
  0x12   :  { %v1395_v3 = vpack.c.bf16 %v295_v62, %v294_v61  ;;  %v124_v8 = vld [vmem:[%s2327_s0 + $0x50] sm:$0xff]  ;;  %v1399_v10 = vpack.c.bf16 %v297_v5, %v296_v4  ;;  %v298_v11 = vld [vmem:[%s2326_s1 + $0x140] sm:$0xff]  ;;  %v299_v12 = vld [vmem:[%s2326_s1 + $0x148] sm:$0xff] }
  0x13   :  { %v232_v9 = vld [vmem:[%s2327_s0 + $0x3b0] sm:$0xff]  ;;  %v123_v13 = vld [vmem:[%s2327_s0 + $0x48] sm:$0xff]  ;;  %v301_v19 = vld [vmem:[%s2326_s1 + $0x158] sm:$0xff] }
  0x14   :  { %1353 = vmatpush1.bf16.msra.mxu0 %v1352_v17  ;;  %1439 = vmatpush1.bf16.msra.mxu1 %v1352_v17  ;;  %v231_v14 = vld [vmem:[%s2327_s0 + $0x3a8] sm:$0xff]  ;;  %v1403_v17 = vpack.c.bf16 %v299_v12, %v298_v11  ;;  %v300_v18 = vld [vmem:[%s2326_s1 + $0x150] sm:$0xff]  ;;  %v234_v21 = vld [vmem:[%s2327_s0 + $0x3c0] sm:$0xff] }
  0x15   :  { %1354 = vmatprep.subr.bf16.mxu0 %v1452_v0  ;;  %1424 = vmatprep.subr.bf16.mxu1 %v1452_v0  ;;  %v127_v15 = vld [vmem:[%s2327_s0 + $0x68] sm:$0xff]  ;;  %v130_v22 = vld [vmem:[%s2327_s0 + $0x80] sm:$0xff]  ;;  %v1407_v24 = vpack.c.bf16 %v301_v19, %v300_v18  ;;  %v129_v27 = vld [vmem:[%s2327_s0 + $0x78] sm:$0xff] }
  0x16   :  { %v235_v16 = vld [vmem:[%s2327_s0 + $0x3c8] sm:$0xff]  ;;  %v302_v25 = vld [vmem:[%s2326_s1 + $0x160] sm:$0xff]  ;;  %v237_v28 = vld [vmem:[%s2327_s0 + $0x3d8] sm:$0xff] }
  0x17   :  { %v241_v30 = vld [vmem:[%s2327_s0 + $0x3f8] sm:$0xff]  ;;  %v132_v34 = vld [vmem:[%s2327_s0 + $0x90] sm:$0xff]  ;;  %v135_v39 = vld [vmem:[%s2327_s0 + $0xa8] sm:$0xff] }
  0x18   :  { %1356 = vmatpush1.bf16.msra.mxu0 %v1355_v20  ;;  %1440 = vmatpush1.bf16.msra.mxu1 %v1355_v20  ;;  %v126_v20 = vld [vmem:[%s2327_s0 + $0x60] sm:$0xff]  ;;  %v305_v33 = vld [vmem:[%s2326_s1 + $0x178] sm:$0xff]  ;;  %v136_v36 = vld [vmem:[%s2327_s0 + $0xb0] sm:$0xff] }
  0x19   :  { %1357 = vmatprep.subr.bf16.mxu0 %v1452_v0  ;;  %1425 = vmatprep.subr.bf16.mxu1 %v1452_v0  ;;  %v244_v37 = vld [vmem:[%s2327_s0 + $0x410] sm:$0xff]  ;;  %v243_v40 = vld [vmem:[%s2327_s0 + $0x408] sm:$0xff]  ;;  %v138_v43 = vld [vmem:[%s2327_s0 + $0xc0] sm:$0xff] }
  0x1a   :  { %v247_v42 = vld [vmem:[%s2327_s0 + $0x428] sm:$0xff]  ;;  %v142_v45 = vld [vmem:[%s2327_s0 + $0xe0] sm:$0xff]  ;;  %v249_v48 = vld [vmem:[%s2327_s0 + $0x438] sm:$0xff] }
  0x1b   :  { %v250_v46 = vld [vmem:[%s2327_s0 + $0x440] sm:$0xff]  ;;  %v145_v49 = vld [vmem:[%s2327_s0 + $0xf8] sm:$0xff]  ;;  %v144_v51 = vld [vmem:[%s2327_s0 + $0xf0] sm:$0xff] }
  0x1c   :  { %1359 = vmatpush1.bf16.msra.mxu0 %v1358_v23  ;;  %1441 = vmatpush1.bf16.msra.mxu1 %v1358_v23  ;;  %v238_v23 = vld [vmem:[%s2327_s0 + $0x3e0] sm:$0xff]  ;;  %v253_v50 = vld [vmem:[%s2327_s0 + $0x458] sm:$0xff]  ;;  %v256_v54 = vld [vmem:[%s2327_s0 + $0x470] sm:$0xff] }
  0x1d   :  { %1360 = vmatprep.subr.bf16.mxu0 %v1452_v0  ;;  %1426 = vmatprep.subr.bf16.mxu1 %v1452_v0  ;;  %v147_v55 = vld [vmem:[%s2327_s0 + $0x108] sm:$0xff]  ;;  %v154_v61 = vld [vmem:[%s2327_s0 + $0x140] sm:$0xff]  ;;  %v160_v5 = vld [vmem:[%s2327_s0 + $0x170] sm:$0xff] }
  0x1e   :  { %v122_v62 = vld [vmem:[%s2327_s0 + $0x40] sm:$0xff]  ;;  %v131_v4 = vld [vmem:[%s2327_s0 + $0x88] sm:$0xff]  ;;  %v152_v18 = vld [vmem:[%s2327_s0 + $0x130] sm:$0xff] }
  0x1f   :  { %v162_v11 = vld [vmem:[%s2327_s0 + $0x180] sm:$0xff]  ;;  %v143_v12 = vld [vmem:[%s2327_s0 + $0xe8] sm:$0xff]  ;;  %v168_v19 = vld [vmem:[%s2327_s0 + $0x1b0] sm:$0xff] }
  0x20   :  { %1362 = vmatpush1.bf16.msra.mxu0 %v1361_v26  ;;  %1442 = vmatpush1.bf16.msra.mxu1 %v1361_v26  ;;  %v303_v26 = vld [vmem:[%s2326_s1 + $0x168] sm:$0xff] }
  0x21   :  { %1363 = vmatprep.subr.bf16.mxu0 %v1452_v0  ;;  %1427 = vmatprep.subr.bf16.mxu1 %v1452_v0  ;;  %v1411_v31 = vpack.c.bf16 %v303_v26, %v302_v25  ;;  %v175_v25 = vld [vmem:[%s2327_s0 + $0x1e8] sm:$0xff]  ;;  %v164_v26 = vld [vmem:[%s2327_s0 + $0x190] sm:$0xff] }
  0x24   :  { %1365 = vmatpush1.bf16.msra.mxu0 %v1364_v29  ;;  %1443 = vmatpush1.bf16.msra.mxu1 %v1364_v29  ;;  %v133_v29 = vld [vmem:[%s2327_s0 + $0x98] sm:$0xff] }
  0x25   :  { %1366 = vmatprep.subr.bf16.mxu0 %v1452_v0  ;;  %1428 = vmatprep.subr.bf16.mxu1 %v1452_v0 }
  0x28   :  { %1368 = vmatpush1.bf16.msra.mxu0 %v1367_v32  ;;  %1444 = vmatpush1.bf16.msra.mxu1 %v1367_v32  ;;  %v304_v32 = vld [vmem:[%s2326_s1 + $0x170] sm:$0xff] }
  0x29   :  { %1369 = vmatprep.subr.bf16.mxu0 %v1452_v0  ;;  %1429 = vmatprep.subr.bf16.mxu1 %v1452_v0 }
  0x2c   :  { %1371 = vmatpush1.bf16.msra.mxu0 %v1370_v35  ;;  %1445 = vmatpush1.bf16.msra.mxu1 %v1370_v35  ;;  %v240_v35 = vld [vmem:[%s2327_s0 + $0x3f0] sm:$0xff] }
  0x2d   :  { %1372 = vmatprep.subr.bf16.mxu0 %v1452_v0  ;;  %1430 = vmatprep.subr.bf16.mxu1 %v1452_v0 }
  0x30   :  { %1374 = vmatpush1.bf16.msra.mxu0 %v1373_v38  ;;  %1446 = vmatpush1.bf16.msra.mxu1 %v1373_v38  ;;  %v1415_v38 = vpack.c.bf16 %v305_v33, %v304_v32  ;;  %v173_v32 = vld [vmem:[%s2327_s0 + $0x1d8] sm:$0xff] }
  0x31   :  { %1375 = vmatprep.subr.bf16.mxu0 %v1452_v0  ;;  %1431 = vmatprep.subr.bf16.mxu1 %v1452_v0  ;;  %v181_v33 = vld [vmem:[%s2327_s0 + $0x218] sm:$0xff] }
  0x34   :  { %1377 = vmatpush1.bf16.msra.mxu0 %v1376_v41  ;;  %1447 = vmatpush1.bf16.msra.mxu1 %v1376_v41  ;;  %v139_v41 = vld [vmem:[%s2327_s0 + $0xc8] sm:$0xff] }
  0x35   :  { %1378 = vmatprep.subr.bf16.mxu0 %v1452_v0  ;;  %1432 = vmatprep.subr.bf16.mxu1 %v1452_v0 }
  0x38   :  { %1380 = vmatpush1.bf16.msra.mxu0 %v1379_v44  ;;  %1448 = vmatpush1.bf16.msra.mxu1 %v1379_v44  ;;  %v246_v44 = vld [vmem:[%s2327_s0 + $0x420] sm:$0xff] }
  0x39   :  { %1381 = vmatprep.subr.bf16.mxu0 %v1452_v0  ;;  %1433 = vmatprep.subr.bf16.mxu1 %v1452_v0 }
  0x3c   :  { %1383 = vmatpush1.bf16.msra.mxu0 %v1382_v47  ;;  %1449 = vmatpush1.bf16.msra.mxu1 %v1382_v47  ;;  %v141_v47 = vld [vmem:[%s2327_s0 + $0xd8] sm:$0xff] }
  0x3d   :  { %1384 = vmatprep.subr.bf16.mxu0 %v1452_v0  ;;  %1434 = vmatprep.subr.bf16.mxu1 %v1452_v0  ;;  %v225_v0 = vld [vmem:[%s2327_s0 + $0x378] sm:$0xff] }
  0x40   :  { %1386 = vmatpush1.bf16.msra.mxu0 %v1385_v52  ;;  %1450 = vmatpush1.bf16.msra.mxu1 %v1385_v52  ;;  %v252_v52 = vld [vmem:[%s2327_s0 + $0x450] sm:$0xff] }
  0x41   :  { %1388 = vmatprep.subr.bf16.mxu1 %v1387_v53 }
  0x43   :  { %371 = vmatmul.mubr.f32.vlgmr.msra.gmra.mrb[0].mxu0 %v114_v56  ;;  %551 = vmatmul.mubr.f32.vlgmr.msra.gmra.mrb[0].mxu1 %v222_v57  ;;  %v255_v56 = vld [vmem:[%s2327_s0 + $0x468] sm:$0xff] }
  0x44   :  { %1390 = vmatpush3.bf16.msra.mxu1 %v1387_v53  ;;  %375 = vmatprep.mubr.f32.mxu0 %v118_v58  ;;  %v148_v53 = vld [vmem:[%s2327_s0 + $0x110] sm:$0xff]  ;;  %v151_v57 = vld [vmem:[%s2327_s0 + $0x128] sm:$0xff] }
  0x45   :  { %555 = vmatprep.mubr.f32.mxu1 %v226_v60  ;;  %1392 = vmatprep.subr.bf16.mxu1 %v1391_v59  ;;  %v116_v58 = vld [vmem:[%s2327_s0 + $0x10] sm:$0xff]  ;;  %v119_v60 = vld [vmem:[%s2327_s0 + $0x28] sm:$0xff] }
  0x47   :  { %376 = vmatmul.mubr.f32.gmra.mrb[2].mxu0 %v117_v63  ;;  %556 = vmatmul.mubr.f32.gmra.mrb[2].mxu1 %v225_v0  ;;  %v153_v63 = vld [vmem:[%s2327_s0 + $0x138] sm:$0xff] }
  0x48   :  { %380 = vmatprep.mubr.f32.mxu0 %v121_v1  ;;  %560 = vmatprep.mubr.f32.mxu1 %v229_v2  ;;  %v125_v0 = vld [vmem:[%s2327_s0 + $0x58] sm:$0xff]  ;;  %v128_v2 = vld [vmem:[%s2327_s0 + $0x70] sm:$0xff] }
  0x49   :  { %1394 = vmatpush3.bf16.msra.mxu1 %v1391_v59  ;;  %v150_v59 = vld [vmem:[%s2327_s0 + $0x120] sm:$0xff]  ;;  %v157_v1 = vld [vmem:[%s2327_s0 + $0x158] sm:$0xff] }
  0x4a   :  { %1396 = vmatprep.subr.bf16.mxu1 %v1395_v3 }
  0x4b   :  { %381 = vmatmul.mubr.f32.gmra.mrb[4].mxu0 %v120_v6  ;;  %561 = vmatmul.mubr.f32.gmra.mrb[4].mxu1 %v228_v7  ;;  %v134_v6 = vld [vmem:[%s2327_s0 + $0xa0] sm:$0xff]  ;;  %v159_v7 = vld [vmem:[%s2327_s0 + $0x168] sm:$0xff] }
  0x4c   :  { %385 = vmatprep.mubr.f32.mxu0 %v124_v8  ;;  %565 = vmatprep.mubr.f32.mxu1 %v232_v9  ;;  %v137_v8 = vld [vmem:[%s2327_s0 + $0xb8] sm:$0xff]  ;;  %v163_v9 = vld [vmem:[%s2327_s0 + $0x188] sm:$0xff] }
  0x4d   :  { %1398 = vmatpush3.bf16.msra.mxu1 %v1395_v3  ;;  %v156_v3 = vld [vmem:[%s2327_s0 + $0x150] sm:$0xff] }
  0x4e   :  { %1400 = vmatprep.subr.bf16.mxu1 %v1399_v10 }
  0x4f   :  { %386 = vmatmul.mubr.f32.gmra.mrb[6].mxu0 %v123_v13  ;;  %566 = vmatmul.mubr.f32.gmra.mrb[6].mxu1 %v231_v14  ;;  %v166_v13 = vld [vmem:[%s2327_s0 + $0x1a0] sm:$0xff] }
  0x50   :  { %390 = vmatprep.mubr.f32.mxu0 %v127_v15  ;;  %570 = vmatprep.mubr.f32.mxu1 %v235_v16  ;;  %v146_v14 = vld [vmem:[%s2327_s0 + $0x100] sm:$0xff]  ;;  %v165_v15 = vld [vmem:[%s2327_s0 + $0x198] sm:$0xff] }
  0x51   :  { %1402 = vmatpush3.bf16.msra.mxu1 %v1399_v10  ;;  %v140_v10 = vld [vmem:[%s2327_s0 + $0xd0] sm:$0xff]  ;;  %v149_v16 = vld [vmem:[%s2327_s0 + $0x118] sm:$0xff] }
  0x52   :  { %1404 = vmatprep.subr.bf16.mxu1 %v1403_v17 }
  0x53   :  { %391 = vmatmul.mubr.f32.gmra.mrb[8].mxu0 %v126_v20  ;;  %571 = vmatmul.mubr.f32.gmra.mrb[8].mxu1 %v234_v21  ;;  %v155_v20 = vld [vmem:[%s2327_s0 + $0x148] sm:$0xff]  ;;  %v172_v21 = vld [vmem:[%s2327_s0 + $0x1d0] sm:$0xff] }
  0x54   :  { %395 = vmatprep.mubr.f32.mxu0 %v130_v22  ;;  %575 = vmatprep.mubr.f32.mxu1 %v238_v23  ;;  %v158_v22 = vld [vmem:[%s2327_s0 + $0x160] sm:$0xff]  ;;  %v171_v23 = vld [vmem:[%s2327_s0 + $0x1c8] sm:$0xff] }
  0x55   :  { %1406 = vmatpush3.bf16.msra.mxu1 %v1403_v17  ;;  %v169_v17 = vld [vmem:[%s2327_s0 + $0x1b8] sm:$0xff] }
  0x56   :  { %1408 = vmatprep.subr.bf16.mxu1 %v1407_v24 }
  0x57   :  { %396 = vmatmul.mubr.f32.gmra.mrb[10].mxu0 %v129_v27  ;;  %576 = vmatmul.mubr.f32.gmra.mrb[10].mxu1 %v237_v28  ;;  %v174_v27 = vld [vmem:[%s2327_s0 + $0x1e0] sm:$0xff]  ;;  %v167_v28 = vld [vmem:[%s2327_s0 + $0x1a8] sm:$0xff] }
  0x58   :  { %400 = vmatprep.mubr.f32.mxu0 %v133_v29  ;;  %580 = vmatprep.mubr.f32.mxu1 %v241_v30  ;;  %v178_v29 = vld [vmem:[%s2327_s0 + $0x200] sm:$0xff] }
  0x59   :  { %1410 = vmatpush3.bf16.msra.mxu1 %v1407_v24  ;;  %v161_v24 = vld [vmem:[%s2327_s0 + $0x178] sm:$0xff]  ;;  %v170_v30 = vld [vmem:[%s2327_s0 + $0x1c0] sm:$0xff] }
  0x5a   :  { %1412 = vmatprep.subr.bf16.mxu1 %v1411_v31 }
  0x5b   :  { %401 = vmatmul.mubr.f32.gmra.mrb[12].mxu0 %v132_v34  ;;  %581 = vmatmul.mubr.f32.gmra.mrb[12].mxu1 %v240_v35  ;;  %v176_v34 = vld [vmem:[%s2327_s0 + $0x1f0] sm:$0xff] }
  0x5c   :  { %405 = vmatprep.mubr.f32.mxu0 %v136_v36  ;;  %585 = vmatprep.mubr.f32.mxu1 %v244_v37  ;;  %v180_v35 = vld [vmem:[%s2327_s0 + $0x210] sm:$0xff]  ;;  %v179_v36 = vld [vmem:[%s2327_s0 + $0x208] sm:$0xff] }
  0x5d   :  { %1414 = vmatpush3.bf16.msra.mxu1 %v1411_v31  ;;  %v177_v31 = vld [vmem:[%s2327_s0 + $0x1f8] sm:$0xff]  ;;  %v184_v37 = vld [vmem:[%s2327_s0 + $0x230] sm:$0xff] }
  0x5e   :  { %1416 = vmatprep.subr.bf16.mxu1 %v1415_v38 }
  0x5f   :  { %406 = vmatmul.mubr.f32.gmra.mrb[14].mxu0 %v135_v39  ;;  %586 = vmatmul.mubr.f32.gmra.mrb[14].mxu1 %v243_v40  ;;  %v183_v39 = vld [vmem:[%s2327_s0 + $0x228] sm:$0xff]  ;;  %v185_v40 = vld [vmem:[%s2327_s0 + $0x238] sm:$0xff] }
  0x60   :  { %410 = vmatprep.mubr.f32.mxu0 %v139_v41  ;;  %590 = vmatprep.mubr.f32.mxu1 %v247_v42  ;;  %v187_v41 = vld [vmem:[%s2327_s0 + $0x248] sm:$0xff]  ;;  %v188_v42 = vld [vmem:[%s2327_s0 + $0x250] sm:$0xff] }
  0x61   :  { %1418 = vmatpush3.bf16.msra.mxu1 %v1415_v38  ;;  %v182_v38 = vld [vmem:[%s2327_s0 + $0x220] sm:$0xff] }
  0x63   :  { %411 = vmatmul.mubr.f32.gmra.mrb[16].mxu0 %v138_v43  ;;  %591 = vmatmul.mubr.f32.gmra.mrb[16].mxu1 %v246_v44  ;;  %v186_v43 = vld [vmem:[%s2327_s0 + $0x240] sm:$0xff]  ;;  %v191_v44 = vld [vmem:[%s2327_s0 + $0x268] sm:$0xff] }
  0x64   :  { %415 = vmatprep.mubr.f32.mxu0 %v142_v45  ;;  %595 = vmatprep.mubr.f32.mxu1 %v250_v46  ;;  %v190_v45 = vld [vmem:[%s2327_s0 + $0x260] sm:$0xff] }
  0x65   :  { %v194_v46 = vld [vmem:[%s2327_s0 + $0x280] sm:$0xff] }
  0x67   :  { %416 = vmatmul.mubr.f32.gmra.mrb[18].mxu0 %v141_v47  ;;  %596 = vmatmul.mubr.f32.gmra.mrb[18].mxu1 %v249_v48  ;;  %v189_v47 = vld [vmem:[%s2327_s0 + $0x258] sm:$0xff] }
  0x68   :  { %420 = vmatprep.mubr.f32.mxu0 %v145_v49  ;;  %600 = vmatprep.mubr.f32.mxu1 %v253_v50  ;;  %v197_v48 = vld [vmem:[%s2327_s0 + $0x298] sm:$0xff]  ;;  %v200_v50 = vld [vmem:[%s2327_s0 + $0x2b0] sm:$0xff] }
  0x69   :  { %v193_v49 = vld [vmem:[%s2327_s0 + $0x278] sm:$0xff] }
  0x6b   :  { %421 = vmatmul.mubr.f32.gmra.mrb[20].mxu0 %v144_v51  ;;  %601 = vmatmul.mubr.f32.gmra.mrb[20].mxu1 %v252_v52  ;;  %v192_v51 = vld [vmem:[%s2327_s0 + $0x270] sm:$0xff]  ;;  %v203_v52 = vld [vmem:[%s2327_s0 + $0x2c8] sm:$0xff] }
  0x6c   :  { %425 = vmatprep.mubr.f32.mxu0 %v148_v53  ;;  %605 = vmatprep.mubr.f32.mxu1 %v256_v54  ;;  %v196_v53 = vld [vmem:[%s2327_s0 + $0x290] sm:$0xff]  ;;  %v206_v54 = vld [vmem:[%s2327_s0 + $0x2e0] sm:$0xff] }
  0x6f   :  { %426 = vmatmul.mubr.f32.gmra.mrb[22].mxu0 %v147_v55  ;;  %606 = vmatmul.mubr.f32.gmra.mrb[22].mxu1 %v255_v56  ;;  %v195_v55 = vld [vmem:[%s2327_s0 + $0x288] sm:$0xff]  ;;  %v209_v56 = vld [vmem:[%s2327_s0 + $0x2f8] sm:$0xff] }
  0x70   :  { %430 = vmatprep.mubr.f32.mxu0 %v151_v57  ;;  %1267 = vmatprep.mubr.f32.mxu1 %v116_v58  ;;  %v199_v57 = vld [vmem:[%s2327_s0 + $0x2a8] sm:$0xff]  ;;  %v212_v58 = vld [vmem:[%s2327_s0 + $0x310] sm:$0xff] }
  0x73   :  { %431 = vmatmul.mubr.f32.gmra.mrb[24].mxu0 %v150_v59  ;;  %1268 = vmatmul.mubr.f32.vlgmr.msra.gmra.mrb[24].mxu1 %v119_v60  ;;  %v198_v59 = vld [vmem:[%s2327_s0 + $0x2a0] sm:$0xff]  ;;  %v215_v60 = vld [vmem:[%s2327_s0 + $0x328] sm:$0xff] }
  0x74   :  { %435 = vmatprep.mubr.f32.mxu0 %v154_v61  ;;  %1270 = vmatprep.mubr.f32.mxu1 %v122_v62  ;;  %v202_v61 = vld [vmem:[%s2327_s0 + $0x2c0] sm:$0xff] }
  0x75   :  { %v218_v62 = vld [vmem:[%s2327_s0 + $0x340] sm:$0xff] }
  0x77   :  { %436 = vmatmul.mubr.f32.gmra.mrb[26].mxu0 %v153_v63  ;;  %1271 = vmatmul.mubr.f32.gmra.mrb[26].mxu1 %v125_v0  ;;  %v201_v63 = vld [vmem:[%s2327_s0 + $0x2b8] sm:$0xff] }
  0x78   :  { %440 = vmatprep.mubr.f32.mxu0 %v157_v1  ;;  %1273 = vmatprep.mubr.f32.mxu1 %v128_v2  ;;  %v221_v0 = vld [vmem:[%s2327_s0 + $0x358] sm:$0xff]  ;;  %v224_v2 = vld [vmem:[%s2327_s0 + $0x370] sm:$0xff] }
  0x79   :  { %v205_v1 = vld [vmem:[%s2327_s0 + $0x2d8] sm:$0xff] }
  0x7b   :  { %441 = vmatmul.mubr.f32.gmra.mrb[28].mxu0 %v156_v3  ;;  %1274 = vmatmul.mubr.f32.gmra.mrb[28].mxu1 %v131_v4  ;;  %v204_v3 = vld [vmem:[%s2327_s0 + $0x2d0] sm:$0xff]  ;;  %v227_v4 = vld [vmem:[%s2327_s0 + $0x388] sm:$0xff] }
  0x7c   :  { %445 = vmatprep.mubr.f32.mxu0 %v160_v5  ;;  %1276 = vmatprep.mubr.f32.mxu1 %v134_v6  ;;  %v208_v5 = vld [vmem:[%s2327_s0 + $0x2f0] sm:$0xff]  ;;  %v230_v6 = vld [vmem:[%s2327_s0 + $0x3a0] sm:$0xff] }
  0x7f   :  { %446 = vmatmul.mubr.f32.gmra.mrb[30].mxu0 %v159_v7  ;;  %1277 = vmatmul.mubr.f32.gmra.mrb[30].mxu1 %v137_v8  ;;  %v207_v7 = vld [vmem:[%s2327_s0 + $0x2e8] sm:$0xff]  ;;  %v233_v8 = vld [vmem:[%s2327_s0 + $0x3b8] sm:$0xff] }
  0x80   :  { %450 = vmatprep.mubr.f32.mxu0 %v163_v9  ;;  %1279 = vmatprep.mubr.f32.mxu1 %v140_v10  ;;  %v211_v9 = vld [vmem:[%s2327_s0 + $0x308] sm:$0xff]  ;;  %v236_v10 = vld [vmem:[%s2327_s0 + $0x3d0] sm:$0xff] }
  0x83   :  { %451 = vmatmul.mubr.f32.gmra.mrb[32].mxu0 %v162_v11  ;;  %1280 = vmatmul.mubr.f32.gmra.mrb[32].mxu1 %v143_v12  ;;  %v210_v11 = vld [vmem:[%s2327_s0 + $0x300] sm:$0xff]  ;;  %v239_v12 = vld [vmem:[%s2327_s0 + $0x3e8] sm:$0xff] }
  0x84   :  { %455 = vmatprep.mubr.f32.mxu0 %v166_v13  ;;  %1282 = vmatprep.mubr.f32.mxu1 %v146_v14  ;;  %v214_v13 = vld [vmem:[%s2327_s0 + $0x320] sm:$0xff] }
  0x85   :  { %v242_v14 = vld [vmem:[%s2327_s0 + $0x400] sm:$0xff] }
  0x87   :  { %456 = vmatmul.mubr.f32.gmra.mrb[34].mxu0 %v165_v15  ;;  %1283 = vmatmul.mubr.f32.gmra.mrb[34].mxu1 %v149_v16  ;;  %v213_v15 = vld [vmem:[%s2327_s0 + $0x318] sm:$0xff] }
  0x88   :  { %460 = vmatprep.mubr.f32.mxu0 %v169_v17  ;;  %1285 = vmatprep.mubr.f32.mxu1 %v152_v18  ;;  %v245_v16 = vld [vmem:[%s2327_s0 + $0x418] sm:$0xff]  ;;  %v248_v18 = vld [vmem:[%s2327_s0 + $0x430] sm:$0xff] }
  0x89   :  { %v217_v17 = vld [vmem:[%s2327_s0 + $0x338] sm:$0xff] }
  0x8b   :  { %461 = vmatmul.mubr.f32.gmra.mrb[36].mxu0 %v168_v19  ;;  %1286 = vmatmul.mubr.f32.gmra.mrb[36].mxu1 %v155_v20  ;;  %v216_v19 = vld [vmem:[%s2327_s0 + $0x330] sm:$0xff]  ;;  %v251_v20 = vld [vmem:[%s2327_s0 + $0x448] sm:$0xff] }
  0x8c   :  { %465 = vmatprep.mubr.f32.mxu0 %v172_v21  ;;  %1288 = vmatprep.mubr.f32.mxu1 %v158_v22  ;;  %v220_v21 = vld [vmem:[%s2327_s0 + $0x350] sm:$0xff]  ;;  %v254_v22 = vld [vmem:[%s2327_s0 + $0x460] sm:$0xff] }
  0x8f   :  { %466 = vmatmul.mubr.f32.gmra.mrb[38].mxu0 %v171_v23  ;;  %1289 = vmatmul.mubr.f32.gmra.mrb[38].mxu1 %v161_v24  ;;  %v219_v23 = vld [vmem:[%s2327_s0 + $0x348] sm:$0xff]  ;;  %v257_v24 = vld [vmem:[%s2327_s0 + $0x478] sm:$0xff] }
  0x90   :  { %470 = vmatprep.mubr.f32.mxu0 %v175_v25  ;;  %1291 = vmatprep.mubr.f32.mxu1 %v164_v26 }
  0x93   :  { %471 = vmatmul.mubr.f32.gmra.mrb[40].mxu0 %v174_v27  ;;  %1292 = vmatmul.mubr.f32.gmra.mrb[40].mxu1 %v167_v28 }
  0x94   :  { %475 = vmatprep.mubr.f32.mxu0 %v178_v29  ;;  %1294 = vmatprep.mubr.f32.mxu1 %v170_v30 }
  0x97   :  { %476 = vmatmul.mubr.f32.gmra.mrb[42].mxu0 %v177_v31  ;;  %1295 = vmatmul.mubr.f32.gmra.mrb[42].mxu1 %v173_v32 }
  0x98   :  { %480 = vmatprep.mubr.f32.mxu0 %v181_v33  ;;  %1297 = vmatprep.mubr.f32.mxu1 %v176_v34 }
  0x9b   :  { %481 = vmatmul.mubr.f32.gmra.mrb[44].mxu0 %v180_v35  ;;  %1298 = vmatmul.mubr.f32.gmra.mrb[44].mxu1 %v179_v36 }
  0x9c   :  { %485 = vmatprep.mubr.f32.mxu0 %v184_v37  ;;  %1300 = vmatprep.mubr.f32.mxu1 %v182_v38 }
  0x9f   :  { %486 = vmatmul.mubr.f32.gmra.mrb[46].mxu0 %v183_v39  ;;  %1301 = vmatmul.mubr.f32.gmra.mrb[46].mxu1 %v185_v40 }
  0xa0   :  { %490 = vmatprep.mubr.f32.mxu0 %v187_v41  ;;  %1303 = vmatprep.mubr.f32.mxu1 %v188_v42 }
  0xa3   :  { %491 = vmatmul.mubr.f32.gmra.mrb[48].mxu0 %v186_v43  ;;  %1304 = vmatmul.mubr.f32.gmra.mrb[48].mxu1 %v191_v44 }
  0xa4   :  { %495 = vmatprep.mubr.f32.mxu0 %v190_v45  ;;  %1306 = vmatprep.mubr.f32.mxu1 %v194_v46 }
  0xa7   :  { %496 = vmatmul.mubr.f32.gmra.mrb[50].mxu0 %v189_v47  ;;  %1307 = vmatmul.mubr.f32.gmra.mrb[50].mxu1 %v197_v48 }
  0xa8   :  { %500 = vmatprep.mubr.f32.mxu0 %v193_v49  ;;  %1309 = vmatprep.mubr.f32.mxu1 %v200_v50 }
  0xab   :  { %501 = vmatmul.mubr.f32.gmra.mrb[52].mxu0 %v192_v51  ;;  %1310 = vmatmul.mubr.f32.gmra.mrb[52].mxu1 %v203_v52 }
  0xac   :  { %505 = vmatprep.mubr.f32.mxu0 %v196_v53  ;;  %1312 = vmatprep.mubr.f32.mxu1 %v206_v54 }
  0xaf   :  { %506 = vmatmul.mubr.f32.gmra.mrb[54].mxu0 %v195_v55  ;;  %1313 = vmatmul.mubr.f32.gmra.mrb[54].mxu1 %v209_v56 }
  0xb0   :  { %510 = vmatprep.mubr.f32.mxu0 %v199_v57  ;;  %1315 = vmatprep.mubr.f32.mxu1 %v212_v58 }
  0xb3   :  { %511 = vmatmul.mubr.f32.gmra.mrb[56].mxu0 %v198_v59  ;;  %1316 = vmatmul.mubr.f32.gmra.mrb[56].mxu1 %v215_v60 }
  0xb4   :  { %515 = vmatprep.mubr.f32.mxu0 %v202_v61  ;;  %1318 = vmatprep.mubr.f32.mxu1 %v218_v62 }
  0xb7   :  { %516 = vmatmul.mubr.f32.gmra.mrb[58].mxu0 %v201_v63  ;;  %1319 = vmatmul.mubr.f32.gmra.mrb[58].mxu1 %v221_v0 }
  0xb8   :  { %520 = vmatprep.mubr.f32.mxu0 %v205_v1  ;;  %1321 = vmatprep.mubr.f32.mxu1 %v224_v2 }
  0xbb   :  { %521 = vmatmul.mubr.f32.gmra.mrb[60].mxu0 %v204_v3  ;;  %1322 = vmatmul.mubr.f32.gmra.mrb[60].mxu1 %v227_v4 }
  0xbc   :  { %525 = vmatprep.mubr.f32.mxu0 %v208_v5  ;;  %1324 = vmatprep.mubr.f32.mxu1 %v230_v6 }
  0xbf   :  { %526 = vmatmul.mubr.f32.gmra.mrb[62].mxu0 %v207_v7  ;;  %1325 = vmatmul.mubr.f32.gmra.mrb[62].mxu1 %v233_v8 }
  0xc0   :  { %530 = vmatprep.mubr.f32.mxu0 %v211_v9  ;;  %1327 = vmatprep.mubr.f32.mxu1 %v236_v10  ;;  %v2112_v10 = vld [vmem:[%s2328_s2] ss:$0 sm:$0xff] }
  0xc3   :  { %531 = vmatmul.mubr.f32.gmra.mrb[64].mxu0 %v210_v11  ;;  %1328 = vmatmul.mubr.f32.gmra.mrb[64].mxu1 %v239_v12 }
  0xc4   :  { %535 = vmatprep.mubr.f32.mxu0 %v214_v13  ;;  %1330 = vmatprep.mubr.f32.mxu1 %v242_v14 }
  0xc7   :  { %536 = vmatmul.mubr.f32.gmra.mrb[66].mxu0 %v213_v15  ;;  %1331 = vmatmul.mubr.f32.gmra.mrb[66].mxu1 %v245_v16 }
  0xc8   :  { %540 = vmatprep.mubr.f32.mxu0 %v217_v17  ;;  %1333 = vmatprep.mubr.f32.mxu1 %v248_v18 }
  0xcb   :  { %541 = vmatmul.mubr.f32.gmra.mrb[68].mxu0 %v216_v19  ;;  %1334 = vmatmul.mubr.f32.gmra.mrb[68].mxu1 %v251_v20 }
  0xcc   :  { %545 = vmatprep.mubr.f32.mxu0 %v220_v21  ;;  %1336 = vmatprep.mubr.f32.mxu1 %v254_v22 }
  0xcf   :  { %546 = vmatmul.mubr.f32.gmra.mrb[70].mxu0 %v219_v23  ;;  %1337 = vmatmul.mubr.f32.gmra.mrb[70].mxu1 %v257_v24 }
 0x116   :  { %v2081_v25 = vpop.f32.mrb[0].mxu1  ;;  %v372_v26 = vpop.f32.mrb[0].mxu0 }
 0x117   :  { %v554_v27 = vpop.f32.mrb[1].mxu1  ;;  %v374_v28 = vpop.f32.mrb[1].mxu0 }
 0x11a   :  { %v2083_v29 = vpop.f32.mrb[2].mxu1  ;;  %v377_v30 = vpop.f32.mrb[2].mxu0 }
 0x11b   :  { %v559_v31 = vpop.f32.mrb[3].mxu1  ;;  %v379_v32 = vpop.f32.mrb[3].mxu0 }
 0x11e   :  { %v2085_v33 = vpop.f32.mrb[4].mxu1  ;;  %v382_v34 = vpop.f32.mrb[4].mxu0 }
 0x11f   :  { %v564_v35 = vpop.f32.mrb[5].mxu1  ;;  %v384_v36 = vpop.f32.mrb[5].mxu0 }
 0x122   :  { %v2087_v37 = vpop.f32.mrb[6].mxu1  ;;  %v387_v38 = vpop.f32.mrb[6].mxu0 }
 0x123   :  { %v569_v39 = vpop.f32.mrb[7].mxu1  ;;  %v389_v40 = vpop.f32.mrb[7].mxu0 }
 0x126   :  { %v2089_v41 = vpop.f32.mrb[8].mxu1  ;;  %v392_v42 = vpop.f32.mrb[8].mxu0 }
 0x127   :  { %v574_v43 = vpop.f32.mrb[9].mxu1  ;;  %v394_v44 = vpop.f32.mrb[9].mxu0 }
 0x12a   :  { %v2091_v45 = vpop.f32.mrb[10].mxu1  ;;  %v397_v46 = vpop.f32.mrb[10].mxu0 }
 0x12b   :  { %v579_v47 = vpop.f32.mrb[11].mxu1  ;;  %v399_v48 = vpop.f32.mrb[11].mxu0 }
 0x12e   :  { %v2093_v49 = vpop.f32.mrb[12].mxu1  ;;  %v402_v50 = vpop.f32.mrb[12].mxu0 }
 0x12f   :  { %v584_v51 = vpop.f32.mrb[13].mxu1  ;;  %v404_v52 = vpop.f32.mrb[13].mxu0 }
 0x132   :  { %v2095_v53 = vpop.f32.mrb[14].mxu1  ;;  %v407_v54 = vpop.f32.mrb[14].mxu0 }
 0x133   :  { %v589_v55 = vpop.f32.mrb[15].mxu1  ;;  %v409_v56 = vpop.f32.mrb[15].mxu0 }
 0x136   :  { %v2097_v57 = vpop.f32.mrb[16].mxu1  ;;  %v2099_v58 = vpop.f32.mrb[16].mxu0 }
 0x137   :  { %v594_v59 = vpop.f32.mrb[17].mxu1  ;;  %v414_v60 = vpop.f32.mrb[17].mxu0 }
 0x13a   :  { %v2101_v61 = vpop.f32.mrb[18].mxu1  ;;  %v417_v62 = vpop.f32.mrb[18].mxu0 }
 0x13b   :  { %v599_v63 = vpop.f32.mrb[19].mxu1  ;;  %v419_v0 = vpop.f32.mrb[19].mxu0 }
 0x13e   :  { %v2103_v1 = vpop.f32.mrb[20].mxu1  ;;  %v2105_v2 = vpop.f32.mrb[20].mxu0 }
 0x13f   :  { %v604_v3 = vpop.f32.mrb[21].mxu1  ;;  %v424_v4 = vpop.f32.mrb[21].mxu0 }
 0x142   :  { %v2107_v5 = vpop.f32.mrb[22].mxu1  ;;  %v427_v6 = vpop.f32.mrb[22].mxu0 }
 0x143   :  { %v609_v7 = vpop.f32.mrb[23].mxu1  ;;  %v429_v8 = vpop.f32.mrb[23].mxu0 }
 0x146   :  { %v1269_v9 = vpop.f32.mrb[24].mxu1  ;;  %v2114_v11 = vpop.f32.mrb[24].mxu0 }
 0x147   :  { %v683_v12 = vadd.f32 %v1269_v9, %v377_v30  ;;  %v677_v13 = vpop.f32.mrb[25].mxu1  ;;  %v434_v14 = vpop.f32.mrb[25].mxu0 }
 0x148   :  { %v678_v15 = vadd.f32 %v677_v13, %v372_v26 }
 0x149   :  { %v1071_v16 = vadd.f32 %v2112_v10, %v683_v12 }
 0x14a   :  { %v1070_v17 = vadd.f32 %v2112_v10, %v678_v15  ;;  %v1272_v18 = vpop.f32.mrb[26].mxu1  ;;  %v437_v19 = vpop.f32.mrb[26].mxu0 }
 0x14b   :  { %1119 = vst [vmem:[%s2329_s3 + $0x8] sm:$0xff] %v1071_v16  ;;  %v693_v20 = vadd.f32 %v1272_v18, %v387_v38  ;;  %v687_v21 = vpop.f32.mrb[27].mxu1  ;;  %v439_v22 = vpop.f32.mrb[27].mxu0 }
 0x14c   :  { %1118 = vst [vmem:[%s2329_s3] sm:$0xff] %v1070_v17  ;;  %v688_v23 = vadd.f32 %v687_v21, %v382_v34 }
 0x14d   :  { %v1073_v24 = vadd.f32 %v2112_v10, %v693_v20 }
 0x14e   :  { %v1072_v26 = vadd.f32 %v2112_v10, %v688_v23  ;;  %v1275_v27 = vpop.f32.mrb[28].mxu1  ;;  %v442_v28 = vpop.f32.mrb[28].mxu0 }
 0x14f   :  { %1121 = vst [vmem:[%s2329_s3 + $0x18] sm:$0xff] %v1073_v24  ;;  %v703_v30 = vadd.f32 %v1275_v27, %v397_v46  ;;  %v697_v31 = vpop.f32.mrb[29].mxu1  ;;  %v444_v32 = vpop.f32.mrb[29].mxu0 }
 0x150   :  { %1120 = vst [vmem:[%s2329_s3 + $0x10] sm:$0xff] %v1072_v26  ;;  %v698_v35 = vadd.f32 %v697_v31, %v392_v42 }
 0x151   :  { %v1075_v34 = vadd.f32 %v2112_v10, %v703_v30 }
 0x152   :  { %v1074_v36 = vadd.f32 %v2112_v10, %v698_v35  ;;  %v1278_v38 = vpop.f32.mrb[30].mxu1  ;;  %v447_v39 = vpop.f32.mrb[30].mxu0 }
 0x153   :  { %1123 = vst [vmem:[%s2329_s3 + $0x28] sm:$0xff] %v1075_v34  ;;  %v713_v40 = vadd.f32 %v1278_v38, %v407_v54  ;;  %v707_v43 = vpop.f32.mrb[31].mxu1  ;;  %v449_v44 = vpop.f32.mrb[31].mxu0 }
 0x154   :  { %1122 = vst [vmem:[%s2329_s3 + $0x20] sm:$0xff] %v1074_v36  ;;  %v708_v46 = vadd.f32 %v707_v43, %v402_v50 }
 0x155   :  { %v1077_v42 = vadd.f32 %v2112_v10, %v713_v40 }
 0x156   :  { %v1076_v47 = vadd.f32 %v2112_v10, %v708_v46  ;;  %v1281_v48 = vpop.f32.mrb[32].mxu1  ;;  %v452_v51 = vpop.f32.mrb[32].mxu0 }
 0x157   :  { %1125 = vst [vmem:[%s2329_s3 + $0x38] sm:$0xff] %v1077_v42  ;;  %v723_v52 = vadd.f32 %v1281_v48, %v417_v62  ;;  %v717_v55 = vpop.f32.mrb[33].mxu1  ;;  %v454_v54 = vpop.f32.mrb[33].mxu0 }
 0x158   :  { %1124 = vst [vmem:[%s2329_s3 + $0x30] sm:$0xff] %v1076_v47  ;;  %v718_v56 = vadd.f32 %v717_v55, %v2099_v58 }
 0x159   :  { %v1079_v50 = vadd.f32 %v2112_v10, %v723_v52 }
 0x15a   :  { %v1078_v59 = vadd.f32 %v2112_v10, %v718_v56  ;;  %v1284_v60 = vpop.f32.mrb[34].mxu1  ;;  %v457_v63 = vpop.f32.mrb[34].mxu0 }
 0x15b   :  { %1127 = vst [vmem:[%s2329_s3 + $0x48] sm:$0xff] %v1079_v50  ;;  %v733_v0 = vadd.f32 %v1284_v60, %v427_v6  ;;  %v727_v62 = vpop.f32.mrb[35].mxu1  ;;  %v459_v3 = vpop.f32.mrb[35].mxu0 }
 0x15c   :  { %1126 = vst [vmem:[%s2329_s3 + $0x40] sm:$0xff] %v1078_v59  ;;  %v728_v4 = vadd.f32 %v727_v62, %v2105_v2 }
 0x15d   :  { %v1081_v58 = vadd.f32 %v2112_v10, %v733_v0 }
 0x15e   :  { %v1080_v7 = vadd.f32 %v2112_v10, %v728_v4  ;;  %v1287_v8 = vpop.f32.mrb[36].mxu1  ;;  %v462_v9 = vpop.f32.mrb[36].mxu0 }
 0x15f   :  { %1129 = vst [vmem:[%s2329_s3 + $0x58] sm:$0xff] %v1081_v58  ;;  %v743_v12 = vadd.f32 %v1287_v8, %v437_v19  ;;  %v737_v6 = vpop.f32.mrb[37].mxu1  ;;  %v464_v13 = vpop.f32.mrb[37].mxu0 }
 0x160   :  { %1128 = vst [vmem:[%s2329_s3 + $0x50] sm:$0xff] %v1080_v7  ;;  %v738_v14 = vadd.f32 %v737_v6, %v2114_v11 }
 0x161   :  { %v1083_v2 = vadd.f32 %v2112_v10, %v743_v12 }
 0x162   :  { %v1082_v15 = vadd.f32 %v2112_v10, %v738_v14  ;;  %v1290_v16 = vpop.f32.mrb[38].mxu1  ;;  %v467_v17 = vpop.f32.mrb[38].mxu0 }
 0x163   :  { %1131 = vst [vmem:[%s2329_s3 + $0x68] sm:$0xff] %v1083_v2  ;;  %v753_v18 = vadd.f32 %v1290_v16, %v447_v39  ;;  %v747_v19 = vpop.f32.mrb[39].mxu1  ;;  %v469_v20 = vpop.f32.mrb[39].mxu0 }
 0x164   :  { %1130 = vst [vmem:[%s2329_s3 + $0x60] sm:$0xff] %v1082_v15  ;;  %v748_v21 = vadd.f32 %v747_v19, %v442_v28 }
 0x165   :  { %v1085_v11 = vadd.f32 %v2112_v10, %v753_v18 }
 0x166   :  { %v1084_v22 = vadd.f32 %v2112_v10, %v748_v21  ;;  %v1293_v23 = vpop.f32.mrb[40].mxu1  ;;  %v472_v24 = vpop.f32.mrb[40].mxu0 }
 0x167   :  { %1133 = vst [vmem:[%s2329_s3 + $0x78] sm:$0xff] %v1085_v11  ;;  %v763_v26 = vadd.f32 %v1293_v23, %v457_v63  ;;  %v757_v27 = vpop.f32.mrb[41].mxu1  ;;  %v474_v30 = vpop.f32.mrb[41].mxu0 }
 0x168   :  { %1132 = vst [vmem:[%s2329_s3 + $0x70] sm:$0xff] %v1084_v22  ;;  %v758_v31 = vadd.f32 %v757_v27, %v452_v51 }
 0x169   :  { %v1087_v28 = vadd.f32 %v2112_v10, %v763_v26 }
 0x16a   :  { %v1086_v32 = vadd.f32 %v2112_v10, %v758_v31  ;;  %v1296_v35 = vpop.f32.mrb[42].mxu1  ;;  %v477_v34 = vpop.f32.mrb[42].mxu0 }
 0x16b   :  { %1135 = vst [vmem:[%s2329_s3 + $0x88] sm:$0xff] %v1087_v28  ;;  %v773_v36 = vadd.f32 %v1296_v35, %v467_v17  ;;  %v767_v38 = vpop.f32.mrb[43].mxu1  ;;  %v479_v39 = vpop.f32.mrb[43].mxu0 }
 0x16c   :  { %1134 = vst [vmem:[%s2329_s3 + $0x80] sm:$0xff] %v1086_v32  ;;  %v768_v40 = vadd.f32 %v767_v38, %v462_v9 }
 0x16d   :  { %v1089_v43 = vadd.f32 %v2112_v10, %v773_v36 }
 0x16e   :  { %v1088_v44 = vadd.f32 %v2112_v10, %v768_v40  ;;  %v1299_v46 = vpop.f32.mrb[44].mxu1  ;;  %v482_v42 = vpop.f32.mrb[44].mxu0 }
 0x16f   :  { %1137 = vst [vmem:[%s2329_s3 + $0x98] sm:$0xff] %v1089_v43  ;;  %v783_v47 = vadd.f32 %v1299_v46, %v477_v34  ;;  %v777_v48 = vpop.f32.mrb[45].mxu1  ;;  %v484_v51 = vpop.f32.mrb[45].mxu0 }
 0x170   :  { %1136 = vst [vmem:[%s2329_s3 + $0x90] sm:$0xff] %v1088_v44  ;;  %v778_v52 = vadd.f32 %v777_v48, %v472_v24 }
 0x171   :  { %v1091_v55 = vadd.f32 %v2112_v10, %v783_v47 }
 0x172   :  { %v1090_v54 = vadd.f32 %v2112_v10, %v778_v52  ;;  %v1302_v56 = vpop.f32.mrb[46].mxu1  ;;  %v487_v50 = vpop.f32.mrb[46].mxu0 }
 0x173   :  { %1139 = vst [vmem:[%s2329_s3 + $0xa8] sm:$0xff] %v1091_v55  ;;  %v793_v59 = vadd.f32 %v1302_v56, %v487_v50  ;;  %v787_v60 = vpop.f32.mrb[47].mxu1  ;;  %v489_v63 = vpop.f32.mrb[47].mxu0 }
 0x174   :  { %1138 = vst [vmem:[%s2329_s3 + $0xa0] sm:$0xff] %v1090_v54  ;;  %v788_v0 = vadd.f32 %v787_v60, %v482_v42 }
 0x175   :  { %v1093_v62 = vadd.f32 %v2112_v10, %v793_v59 }
 0x176   :  { %v1092_v3 = vadd.f32 %v2112_v10, %v788_v0  ;;  %v1305_v4 = vpop.f32.mrb[48].mxu1  ;;  %v492_v58 = vpop.f32.mrb[48].mxu0 }
 0x177   :  { %1141 = vst [vmem:[%s2329_s3 + $0xb8] sm:$0xff] %v1093_v62  ;;  %v797_v7 = vpop.f32.mrb[49].mxu1  ;;  %v494_v8 = vpop.f32.mrb[49].mxu0 }
 0x178   :  { %1140 = vst [vmem:[%s2329_s3 + $0xb0] sm:$0xff] %v1092_v3  ;;  %v798_v9 = vadd.f32 %v797_v7, %v492_v58 }
 0x17a   :  { %v1094_v12 = vadd.f32 %v2112_v10, %v798_v9  ;;  %v497_v6 = vpop.f32.mrb[50].mxu0  ;;  %v1308_v13 = vpop.f32.mrb[50].mxu1 }
 0x17b   :  { %v803_v14 = vadd.f32 %v1305_v4, %v497_v6  ;;  %v807_v2 = vpop.f32.mrb[51].mxu1  ;;  %v499_v15 = vpop.f32.mrb[51].mxu0 }
 0x17c   :  { %1142 = vst [vmem:[%s2329_s3 + $0xc0] sm:$0xff] %v1094_v12 }
 0x17d   :  { %v1095_v16 = vadd.f32 %v2112_v10, %v803_v14 }
 0x17e   :  { %v502_v17 = vpop.f32.mrb[52].mxu0  ;;  %v1311_v18 = vpop.f32.mrb[52].mxu1 }
 0x17f   :  { %1143 = vst [vmem:[%s2329_s3 + $0xc8] sm:$0xff] %v1095_v16  ;;  %v808_v19 = vadd.f32 %v807_v2, %v502_v17  ;;  %v817_v20 = vpop.f32.mrb[53].mxu1  ;;  %v504_v21 = vpop.f32.mrb[53].mxu0 }
 0x181   :  { %v1096_v11 = vadd.f32 %v2112_v10, %v808_v19 }
 0x182   :  { %v507_v22 = vpop.f32.mrb[54].mxu0  ;;  %v1314_v23 = vpop.f32.mrb[54].mxu1 }
 0x183   :  { %1144 = vst [vmem:[%s2329_s3 + $0xd0] sm:$0xff] %v1096_v11  ;;  %v813_v24 = vadd.f32 %v1308_v13, %v507_v22  ;;  %v827_v26 = vpop.f32.mrb[55].mxu1  ;;  %v509_v27 = vpop.f32.mrb[55].mxu0 }
 0x185   :  { %v1097_v30 = vadd.f32 %v2112_v10, %v813_v24 }
 0x186   :  { %v512_v31 = vpop.f32.mrb[56].mxu0  ;;  %v1317_v28 = vpop.f32.mrb[56].mxu1 }
 0x187   :  { %1145 = vst [vmem:[%s2329_s3 + $0xd8] sm:$0xff] %v1097_v30  ;;  %v818_v32 = vadd.f32 %v817_v20, %v512_v31  ;;  %v837_v35 = vpop.f32.mrb[57].mxu1  ;;  %v514_v34 = vpop.f32.mrb[57].mxu0 }
 0x189   :  { %v1098_v36 = vadd.f32 %v2112_v10, %v818_v32 }
 0x18a   :  { %v517_v38 = vpop.f32.mrb[58].mxu0  ;;  %v2232_v39 = vpop.f32.mrb[58].mxu1 }
 0x18b   :  { %1146 = vst [vmem:[%s2329_s3 + $0xe0] sm:$0xff] %v1098_v36  ;;  %v823_v40 = vadd.f32 %v1311_v18, %v517_v38  ;;  %v847_v43 = vpop.f32.mrb[59].mxu1  ;;  %v519_v44 = vpop.f32.mrb[59].mxu0 }
 0x18d   :  { %v1099_v46 = vadd.f32 %v2112_v10, %v823_v40 }
 0x18e   :  { %v522_v42 = vpop.f32.mrb[60].mxu0  ;;  %v1323_v47 = vpop.f32.mrb[60].mxu1 }
 0x18f   :  { %1147 = vst [vmem:[%s2329_s3 + $0xe8] sm:$0xff] %v1099_v46  ;;  %v828_v48 = vadd.f32 %v827_v26, %v522_v42  ;;  %v863_v51 = vadd.f32 %v1323_v47, %v2083_v29  ;;  %v857_v52 = vpop.f32.mrb[61].mxu1  ;;  %v524_v55 = vpop.f32.mrb[61].mxu0 }
 0x190   :  { %v858_v54 = vadd.f32 %v857_v52, %v2081_v25 }
 0x191   :  { %v1100_v56 = vadd.f32 %v2112_v10, %v828_v48  ;;  %v1107_v50 = vadd.f32 %v2112_v10, %v863_v51 }
 0x192   :  { %v1106_v59 = vadd.f32 %v2112_v10, %v858_v54  ;;  %v527_v60 = vpop.f32.mrb[62].mxu0  ;;  %v1326_v63 = vpop.f32.mrb[62].mxu1 }
 0x193   :  { %1148 = vst [vmem:[%s2329_s3 + $0xf0] sm:$0xff] %v1100_v56  ;;  %1155 = vst [vmem:[%s2329_s3 + $0x128] sm:$0xff] %v1107_v50  ;;  %v833_v29 = vadd.f32 %v1314_v23, %v527_v60  ;;  %v873_v0 = vadd.f32 %v1326_v63, %v2087_v37  ;;  %v867_v25 = vpop.f32.mrb[63].mxu1  ;;  %v529_v62 = vpop.f32.mrb[63].mxu0 }
 0x194   :  { %1154 = vst [vmem:[%s2329_s3 + $0x120] sm:$0xff] %v1106_v59  ;;  %v868_v3 = vadd.f32 %v867_v25, %v2085_v33 }
 0x195   :  { %v1101_v4 = vadd.f32 %v2112_v10, %v833_v29  ;;  %v1109_v58 = vadd.f32 %v2112_v10, %v873_v0 }
 0x196   :  { %v1108_v7 = vadd.f32 %v2112_v10, %v868_v3  ;;  %v532_v8 = vpop.f32.mrb[64].mxu0  ;;  %v1329_v9 = vpop.f32.mrb[64].mxu1 }
 0x197   :  { %1149 = vst [vmem:[%s2329_s3 + $0xf8] sm:$0xff] %v1101_v4  ;;  %1157 = vst [vmem:[%s2329_s3 + $0x138] sm:$0xff] %v1109_v58  ;;  %v838_v37 = vadd.f32 %v837_v35, %v532_v8  ;;  %v883_v12 = vadd.f32 %v1329_v9, %v2091_v45  ;;  %v877_v33 = vpop.f32.mrb[65].mxu1  ;;  %v534_v6 = vpop.f32.mrb[65].mxu0 }
 0x198   :  { %1156 = vst [vmem:[%s2329_s3 + $0x130] sm:$0xff] %v1108_v7  ;;  %v878_v13 = vadd.f32 %v877_v33, %v2089_v41 }
 0x199   :  { %v1102_v14 = vadd.f32 %v2112_v10, %v838_v37  ;;  %v1111_v2 = vadd.f32 %v2112_v10, %v883_v12 }
 0x19a   :  { %v1110_v15 = vadd.f32 %v2112_v10, %v878_v13  ;;  %v537_v16 = vpop.f32.mrb[66].mxu0  ;;  %v1332_v17 = vpop.f32.mrb[66].mxu1 }
 0x19b   :  { %1150 = vst [vmem:[%s2329_s3 + $0x100] sm:$0xff] %v1102_v14  ;;  %1159 = vst [vmem:[%s2329_s3 + $0x148] sm:$0xff] %v1111_v2  ;;  %v843_v45 = vadd.f32 %v1317_v28, %v537_v16  ;;  %v893_v18 = vadd.f32 %v1332_v17, %v2095_v53  ;;  %v887_v41 = vpop.f32.mrb[67].mxu1  ;;  %v539_v19 = vpop.f32.mrb[67].mxu0 }
 0x19c   :  { %1158 = vst [vmem:[%s2329_s3 + $0x140] sm:$0xff] %v1110_v15  ;;  %v888_v20 = vadd.f32 %v887_v41, %v2093_v49 }
 0x19d   :  { %v1103_v21 = vadd.f32 %v2112_v10, %v843_v45  ;;  %v1113_v11 = vadd.f32 %v2112_v10, %v893_v18 }
 0x19e   :  { %v1112_v22 = vadd.f32 %v2112_v10, %v888_v20  ;;  %v542_v23 = vpop.f32.mrb[68].mxu0  ;;  %v1335_v24 = vpop.f32.mrb[68].mxu1 }
 0x19f   :  { %1151 = vst [vmem:[%s2329_s3 + $0x108] sm:$0xff] %v1103_v21  ;;  %1161 = vst [vmem:[%s2329_s3 + $0x158] sm:$0xff] %v1113_v11  ;;  %v848_v53 = vadd.f32 %v847_v43, %v542_v23  ;;  %v903_v26 = vadd.f32 %v1335_v24, %v2101_v61  ;;  %v897_v49 = vpop.f32.mrb[69].mxu1  ;;  %v544_v27 = vpop.f32.mrb[69].mxu0 }
 0x1a0   :  { %1160 = vst [vmem:[%s2329_s3 + $0x150] sm:$0xff] %v1112_v22  ;;  %v898_v30 = vadd.f32 %v897_v49, %v2097_v57 }
 0x1a1   :  { %v1104_v31 = vadd.f32 %v2112_v10, %v848_v53  ;;  %v1115_v28 = vadd.f32 %v2112_v10, %v903_v26 }
 0x1a2   :  { %v1114_v32 = vadd.f32 %v2112_v10, %v898_v30  ;;  %v547_v35 = vpop.f32.mrb[70].mxu0  ;;  %v1338_v34 = vpop.f32.mrb[70].mxu1 }
 0x1a3   :  { %1152 = vst [vmem:[%s2329_s3 + $0x110] sm:$0xff] %v1104_v31  ;;  %1163 = vst [vmem:[%s2329_s3 + $0x168] sm:$0xff] %v1115_v28  ;;  %v853_v61 = vadd.f32 %v2232_v39, %v547_v35  ;;  %v913_v57 = vadd.f32 %v1338_v34, %v2107_v5  ;;  %v907_v36 = vpop.f32.mrb[71].mxu1  ;;  %v549_v38 = vpop.f32.mrb[71].mxu0 }
 0x1a4   :  { %1162 = vst [vmem:[%s2329_s3 + $0x160] sm:$0xff] %v1114_v32  ;;  %v908_v40 = vadd.f32 %v907_v36, %v2103_v1 }
 0x1a5   :  { %v1105_v43 = vadd.f32 %v2112_v10, %v853_v61  ;;  %v1117_v44 = vadd.f32 %v2112_v10, %v913_v57 }
 0x1a6   :  { %v1116_v46 = vadd.f32 %v2112_v10, %v908_v40 }
 0x1a7   :  { %1153 = vst [vmem:[%s2329_s3 + $0x118] sm:$0xff] %v1105_v43  ;;  %1165 = vst [vmem:[%s2329_s3 + $0x178] sm:$0xff] %v1117_v44 }
 0x1a8   :  { %1164 = vst [vmem:[%s2329_s3 + $0x170] sm:$0xff] %v1116_v46 }

</bundles_post_ra>
